<compile_context>
chip_gen: v7x
topology: tpu7x:2x2x1
jax: 0.10.0
libtpu: 0.0.40
codegen_flags: <defaults>
</compile_context>

<pallas_src>
import functools
import math

import jax
import jax.numpy as jnp
from jax import lax
from jax.experimental import pallas as pl
from jax.experimental.pallas import tpu as pltpu

FUSION_DIM = 32   # fusion_dim
NGRAM = 3         # ngram (odd -> symmetric 'same' padding, like torch)


def _round8(n):
    return ((n + 7) // 8) * 8


def _slab_layout(F, C, E, Nk):
    """Row offsets of the packed parameter slab (all sections 8-row aligned)."""
    W = max(6 * F, E, Nk, C)
    off = {}
    off['misc'] = 0                               # 8 rows: A6,B6,bi1,bh1,bi2,bh2,gamma,beta
    off['wh1'] = off['misc'] + 8
    off['wi2'] = off['wh1'] + _round8(2 * F)
    off['wh2'] = off['wi2'] + _round8(2 * F)
    off['q'] = off['wh2'] + _round8(2 * F)
    off['kt'] = off['q'] + _round8(C)
    off['conv'] = off['kt'] + _round8(E)
    off['cb'] = off['conv'] + _round8(C)
    rows = off['cb'] + 8
    return off, rows, W


def _tensorcores_per_chip():
    """Best-effort TensorCores-per-chip (2 on v7x, 1 on v5e/v6e).

    Falls back to 1 on any uncertainty: a batch grid on a single-TC chip would
    only serialize the recurrence, so the safe default is the single-shot call.
    """
    try:
        info = pltpu.get_tpu_info()
        for name in ("num_cores", "num_tensorcores", "tensorcores_per_chip",
                     "cores_per_chip", "core_count"):
            v = getattr(info, name, None)
            if isinstance(v, int) and v >= 1:
                return v
    except Exception:
        pass
    return 1


# ----------------------------------------------------------------------------
# Fused kernel: bidirectional GRU1 -> (sum dirs) -> bidirectional GRU2 ->
# (sum final hiddens) -> cross attention -> attention fusion + LayerNorm +
# channel sum.  One grid step handles BB batches (BB*C independent sequences).
# ----------------------------------------------------------------------------
def cw_lstm_kernel(x_ref, slab_ref, out_ref, *, T, BB, C, F, E, Nk, Rpad):
    Nb = BB * C               # rows per grid step (sequences)
    F2 = 2 * F                # fwd|bwd state width
    G6 = 6 * F                # gate columns: [r_f r_b | z_f z_b | n_f n_b]
    off, _, _ = _slab_layout(F, C, E, Nk)

    # ---- GRU1 input-to-hidden, hoisted off the recurrence (input size 1 ->
    #      broadcast multiply over (T*Nb, 6F)). ----
    x = x_ref[0]                                            # (T*Nb, 2): col0 fwd, col1 reversed
    A6 = slab_ref[off['misc'] + 0:off['misc'] + 1, 0:G6]    # fwd input wt (zeros in bwd cols)
    B6 = slab_ref[off['misc'] + 1:off['misc'] + 2, 0:G6]    # bwd input wt (zeros in fwd cols)
    bi1 = slab_ref[off['misc'] + 2:off['misc'] + 3, 0:G6]
    xg1_all = x[:, 0:1] * A6 + x[:, 1:2] * B6 + bi1         # (T*Nb, 6F)

    wh1 = slab_ref[off['wh1']:off['wh1'] + F2, 0:G6]        # (2F, 6F) block-diag
    bh1 = jnp.broadcast_to(
        slab_ref[off['misc'] + 3:off['misc'] + 4, 0:G6], (Nb, G6))

    def bigru_step(H, xg, whh, bhb):
        # H: (Nb, 2F) = [h_fwd | h_bwd]; gate columns [r_f r_b | z_f z_b | n_f n_b].
        hg = jnp.dot(H, whh, preferred_element_type=jnp.float32) + bhb
        # Fused r|z sigmoid over the lane-aligned first 128 columns (one EUP call).
        rz = jax.nn.sigmoid(xg[:, :2 * F2] + hg[:, :2 * F2])
        r = rz[:, :F2]
        z = rz[:, F2:]
        n = jnp.tanh(xg[:, 2 * F2:] + r * hg[:, 2 * F2:])
        return (1.0 - z) * n + z * H

    H1 = jnp.zeros((Nb, F2), jnp.float32)
    h1 = []
    for t in range(T):                     # fwd+bwd fused, fully unrolled (T static)
        H1 = bigru_step(H1, xg1_all[t * Nb:(t + 1) * Nb, :], wh1, bh1)
        h1.append(H1)

    # GRU1 output summed over directions: mid[t] = h_fwd(t) + h_bwd(t)
    # (h_bwd(t) was produced at unrolled step T-1-t).
    mids = [h1[t][:, :F] + h1[T - 1 - t][:, F:] for t in range(T)]
    ua = jnp.concatenate(mids, axis=0)                       # (T*Nb, F): block t = mid[t]

    # ---- GRU2 (slab reads delayed until here to keep live ranges short). ----
    wi2_top = slab_ref[off['wi2']:off['wi2'] + F, 0:G6]      # fwd input wt -> fwd cols
    wi2_bot = slab_ref[off['wi2'] + F:off['wi2'] + F2, 0:G6]  # bwd input wt -> bwd cols
    bi2 = slab_ref[off['misc'] + 4:off['misc'] + 5, 0:G6]
    P = jnp.dot(ua, wi2_top, preferred_element_type=jnp.float32) + bi2  # (T*Nb, 6F)
    Q = jnp.dot(ua, wi2_bot, preferred_element_type=jnp.float32)        # (T*Nb, 6F)

    wh2 = slab_ref[off['wh2']:off['wh2'] + F2, 0:G6]
    bh2 = jnp.broadcast_to(
        slab_ref[off['misc'] + 5:off['misc'] + 6, 0:G6], (Nb, G6))

    H2 = jnp.zeros((Nb, F2), jnp.float32)
    for t in range(T):
        # fwd consumes mid[t], bwd consumes mid[T-1-t]; no reversed copy needed.
        xg2 = P[t * Nb:(t + 1) * Nb, :] + Q[(T - 1 - t) * Nb:(T - t) * Nb, :]
        H2 = bigru_step(H2, xg2, wh2, bh2)
    last_hidden = H2[:, :F] + H2[:, F:]                      # (Nb, F) == sum(hn, axis=0)

    # ---- cross attention: bmm + banded 'same' conv + LeakyReLU + max-pool +
    #      softmax over channels. ----
    q = slab_ref[off['q']:off['q'] + C, 0:E]
    kT = slab_ref[off['kt']:off['kt'] + E, 0:Nk]
    conv = slab_ref[off['conv']:off['conv'] + C, 0:C]
    cb = slab_ref[off['cb']:off['cb'] + 1, 0:Nk]
    scale = 1.0 / math.sqrt(E)
    g_att = jnp.dot(q * scale, kT, preferred_element_type=jnp.float32)   # (C, Nk)
    u_pre = jnp.dot(conv, g_att, preferred_element_type=jnp.float32) + cb
    u = jnp.where(u_pre >= 0, u_pre, 0.01 * u_pre)                       # LeakyReLU(0.01)
    m = jnp.max(u, axis=1, keepdims=True)                                # (C, 1)
    e = jnp.exp(m - jnp.max(m, axis=0, keepdims=True))
    b = e / jnp.sum(e, axis=0, keepdims=True)                            # softmax over C

    # ---- attention-weighted fusion + residual + LayerNorm + channel sum ----
    # row n = b_local*C + c -> score b[c]; dropout layers are identities.
    score = jnp.concatenate([b] * BB, axis=0) if BB > 1 else b           # (Nb, 1)
    h2v = last_hidden * score + last_hidden
    mean = jnp.mean(h2v, axis=-1, keepdims=True)
    var = jnp.mean(jnp.square(h2v - mean), axis=-1, keepdims=True)
    gamma = slab_ref[off['misc'] + 6:off['misc'] + 7, 0:F]
    beta = slab_ref[off['misc'] + 7:off['misc'] + 8, 0:F]
    normed = (h2v - mean) * lax.rsqrt(var + 1e-5) * gamma + beta

    out_rows = [jnp.sum(normed[i * C:(i + 1) * C, :], axis=0, keepdims=True)
                for i in range(BB)]
    out_bf = jnp.concatenate(out_rows, axis=0)                           # (BB, F)

    # ---- single lane-dense (Rpad, 128) output slab: one unmasked tile store ----
    def padc(a):
        r, c = a.shape
        if c < 128:
            return jnp.concatenate([a, jnp.zeros((r, 128 - c), jnp.float32)], axis=1)
        return a

    parts = [padc(out_bf), padc(b), padc(g_att), padc(u)]
    used = BB + 3 * C
    if Rpad > used:
        parts.append(jnp.zeros((Rpad - used, 128), jnp.float32))
    out_ref[0] = jnp.concatenate(parts, axis=0)


# ----------------------------------------------------------------------------
# Weight layout preprocessing (pure JAX, once per call, outside the kernel).
# Gate-column layout inside the kernel: [r_f r_b | z_f z_b | n_f n_b].
# ----------------------------------------------------------------------------
def _perm_cols(wf, wb, F):
    # wf, wb: (..., 3F) in torch gate order [r|z|n]  ->  (..., 6F) permuted.
    return jnp.concatenate(
        [wf[..., :F], wb[..., :F],
         wf[..., F:2 * F], wb[..., F:2 * F],
         wf[..., 2 * F:], wb[..., 2 * F:]], axis=-1)


def _blockdiag(wf, wb, F):
    # wf, wb: (K, 3F) -> (2K, 6F): rows 0:K map the fwd input to fwd gate
    # columns only; rows K:2K map the bwd input to bwd gate columns only.
    K = wf.shape[0]
    z = jnp.zeros((K, F), wf.dtype)
    top = jnp.concatenate([wf[:, :F], z, wf[:, F:2 * F], z, wf[:, 2 * F:], z],
                          axis=1)
    bot = jnp.concatenate([z, wb[:, :F], z, wb[:, F:2 * F], z, wb[:, 2 * F:]],
                          axis=1)
    return jnp.concatenate([top, bot], axis=0)


def _conv_banded_matrix(conv_w, C):
    # (C, C) banded matrix implementing Conv2d(1,1,(NGRAM,1),'same')
    # cross-correlation along the channel axis:  out = M @ g + bias.
    left = (NGRAM - 1) // 2
    i = jnp.arange(C)[:, None]
    j = jnp.arange(C)[None, :]
    k = j - i + left
    valid = (k >= 0) & (k < NGRAM)
    return jnp.where(valid, conv_w[jnp.clip(k, 0, NGRAM - 1)],
                     0.0).astype(jnp.float32)


# ----------------------------------------------------------------------------
# Full forward (glue in plain JAX; all compute inside the single pallas_call).
# ----------------------------------------------------------------------------
def cw_lstm_forward(x, length, label_embedding, task_embedding, params,
                    num_groups=None):
    del length  # TODO(synk): variable-length packing not implemented.
    B, T, C, _ = x.shape
    F = FUSION_DIM
    E = task_embedding.shape[-1]
    Nk = label_embedding.shape[1]

    # Batch-group grid: >1 only when a second TensorCore is available (v7x);
    # single-TC chips run one grid step (equivalent to the gridless call).
    if num_groups is None:
        num_groups = _tensorcores_per_chip()
    num_groups = max(1, min(int(num_groups), 2, B))
    if B % num_groups != 0:
        num_groups = 1
    G = num_groups
    BB = B // G
    Nb = BB * C

    # ---- x slab: (G, T*Nb, 2); row t*Nb + b_local*C + c; col0 fwd, col1 reversed ----
    xsq = x[..., 0].astype(jnp.float32)                      # (B, T, C)
    x_f = jnp.transpose(xsq, (1, 0, 2))                      # (T, B, C)
    x_r = x_f[::-1]                                          # x[T-1-t]
    xpair = jnp.stack([x_f, x_r], axis=-1)                   # (T, B, C, 2)
    x_slab = (xpair.reshape(T, G, BB, C, 2)
              .transpose(1, 0, 2, 3, 4)
              .reshape(G, T * Nb, 2))

    # ---- parameter slab (single HBM->VMEM DMA) ----
    off, S, W = _slab_layout(F, C, E, Nk)
    wi1blk = _blockdiag(params['wi1'][0], params['wi1'][1], F)   # (2, 6F)
    wh1blk = _blockdiag(params['wh1'][0], params['wh1'][1], F)   # (2F, 6F)
    wi2blk = _blockdiag(params['wi2'][0], params['wi2'][1], F)   # (2F, 6F)
    wh2blk = _blockdiag(params['wh2'][0], params['wh2'][1], F)   # (2F, 6F)
    bi1p = _perm_cols(params['bi1'][0], params['bi1'][1], F)     # (1, 6F)
    bh1p = _perm_cols(params['bh1'][0], params['bh1'][1], F)
    bi2p = _perm_cols(params['bi2'][0], params['bi2'][1], F)
    bh2p = _perm_cols(params['bh2'][0], params['bh2'][1], F)
    q = task_embedding[0].astype(jnp.float32)                    # (C, E)
    kT = jnp.transpose(label_embedding[0]).astype(jnp.float32)   # (E, Nk)
    conv_mat = _conv_banded_matrix(params['conv_w'].astype(jnp.float32), C)
    gamma = params['ln_gamma'].reshape(1, F).astype(jnp.float32)
    beta = params['ln_beta'].reshape(1, F).astype(jnp.float32)

    slab = jnp.zeros((S, W), jnp.float32)

    def put(s, r0, a):
        return lax.dynamic_update_slice(s, a.astype(jnp.float32), (r0, 0))

    slab = put(slab, off['misc'] + 0, wi1blk)        # rows 0..1: A6, B6
    slab = put(slab, off['misc'] + 2, bi1p)
    slab = put(slab, off['misc'] + 3, bh1p)
    slab = put(slab, off['misc'] + 4, bi2p)
    slab = put(slab, off['misc'] + 5, bh2p)
    slab = put(slab, off['misc'] + 6, gamma)
    slab = put(slab, off['misc'] + 7, beta)
    slab = put(slab, off['wh1'], wh1blk)
    slab = put(slab, off['wi2'], wi2blk)
    slab = put(slab, off['wh2'], wh2blk)
    slab = put(slab, off['q'], q)
    slab = put(slab, off['kt'], kT)
    slab = put(slab, off['conv'], conv_mat)
    slab = put(slab, off['cb'],
               jnp.full((1, W), params['conv_b'][0], jnp.float32))

    Rpad = _round8(BB + 3 * C)
    kernel = functools.partial(cw_lstm_kernel,
                               T=T, BB=BB, C=C, F=F, E=E, Nk=Nk, Rpad=Rpad)

    out_slab = pl.pallas_call(
        kernel,
        out_shape=jax.ShapeDtypeStruct((G, Rpad, 128), jnp.float32),
        grid=(G,),
        in_specs=[
            pl.BlockSpec((1, T * Nb, 2), lambda i: (i, 0, 0)),
            pl.BlockSpec((S, W), lambda i: (0, 0)),
        ],
        out_specs=pl.BlockSpec((1, Rpad, 128), lambda i: (i, 0, 0)),
        compiler_params=pltpu.CompilerParams(
            dimension_semantics=("parallel",)),
    )(x_slab, slab)

    # Slice the packed slab back into the torch output shapes.
    out = out_slab[:, :BB, :F].reshape(B, F)                     # (B, F)
    b_score = out_slab[0, BB:BB + C, 0:1]                        # (C, 1)
    g_att = out_slab[0, BB + C:BB + 2 * C, 0:Nk]                 # (C, Nk)
    u = out_slab[0, BB + 2 * C:BB + 3 * C, 0:Nk]                 # (C, Nk)
    return out[:, None, :], b_score[None], g_att[None], u[None]


def init_params(key, F, ngram):
    ks = jax.random.split(key, 10)
    stdv = 1.0 / math.sqrt(F)

    def uni(k, shape, bound):
        return jax.random.uniform(k, shape, jnp.float32, -bound, bound)

    cbound = 1.0 / math.sqrt(ngram)
    return dict(
        # GRU weights, pre-transposed to (in, 3F); leading dim 2 = fwd/bwd,
        # gate column order [r | z | n] (torch convention).
        wi1=uni(ks[0], (2, 1, 3 * F), stdv),
        wh1=uni(ks[1], (2, F, 3 * F), stdv),
        bi1=uni(ks[2], (2, 1, 3 * F), stdv),
        bh1=uni(ks[3], (2, 1, 3 * F), stdv),
        wi2=uni(ks[4], (2, F, 3 * F), stdv),
        wh2=uni(ks[5], (2, F, 3 * F), stdv),
        bi2=uni(ks[6], (2, 1, 3 * F), stdv),
        bh2=uni(ks[7], (2, 1, 3 * F), stdv),
        conv_w=uni(ks[8], (ngram,), cbound),
        conv_b=uni(ks[9], (1,), cbound),
        ln_gamma=jnp.ones((F,), jnp.float32),
        ln_beta=jnp.zeros((F,), jnp.float32),
    )


if __name__ == "__main__":
    B, T, C, E, NK = 2, 8, 4, 32, 25
    key = jax.random.PRNGKey(0)
    kx, kl, kt = jax.random.split(key, 3)

    x = jax.random.normal(kx, (B, T, C, 1), jnp.float32)
    length = [T] * B
    label_embedding = jax.random.normal(kl, (1, NK, E), jnp.float32)
    task_embedding = jax.random.normal(kt, (1, C, E), jnp.float32)

    params = init_params(jax.random.PRNGKey(42), FUSION_DIM, NGRAM)

    outs = cw_lstm_forward(x, length, label_embedding, task_embedding, params)
    jax.block_until_ready(outs)

    last_hidden_att, fused_score, g, u = outs
    assert last_hidden_att.shape == (B, 1, FUSION_DIM)
    assert fused_score.shape == (1, C, 1)
    assert g.shape == (1, C, NK)
    assert u.shape == (1, C, NK)
    print("KERNEL_OK")
</pallas_src>

<mosaic_0001>
module attributes {stable_mosaic.version = 11 : i64} {
  func.func @cw_lstm_kernel(%arg0: i32, %arg1: memref<1x64x2xf32, #tpu.memory_space<vmem>>, %arg2: memref<256x192xf32, #tpu.memory_space<vmem>>, %arg3: memref<1x16x128xf32, #tpu.memory_space<vmem>>) attributes {dimension_semantics = [#tpu.dimension_semantics<parallel>], iteration_bounds = array<i64: 1>, scalar_prefetch = 0 : i64, scratch_operands = 0 : i64, tpu.core_type = #tpu.core_type<tc>, window_params = [{transform_indices = @transform_0, window_bounds = array<i64: 1, 64, 2>}, {pipeline_mode = #tpu.pipeline_mode<synchronous>, transform_indices = @transform_1, window_bounds = array<i64: 256, 192>}, {transform_indices = @transform_2, window_bounds = array<i64: 1, 16, 128>}]} {
    %c0 = arith.constant 0 : index
    %c0_0 = arith.constant 0 : index
    %c0_1 = arith.constant 0 : index
    %0 = vector.load %arg1[%c0, %c0_0, %c0_1] : memref<1x64x2xf32, #tpu.memory_space<vmem>>, vector<1x64x2xf32>
    %1 = vector.shape_cast %0 : vector<1x64x2xf32> to vector<64x2xf32>
    %c0_2 = arith.constant 0 : index
    %c0_3 = arith.constant 0 : index
    %2 = vector.load %arg2[%c0_2, %c0_3] : memref<256x192xf32, #tpu.memory_space<vmem>>, vector<1x192xf32>
    %c1 = arith.constant 1 : index
    %c0_4 = arith.constant 0 : index
    %3 = vector.load %arg2[%c1, %c0_4] : memref<256x192xf32, #tpu.memory_space<vmem>>, vector<1x192xf32>
    %c2 = arith.constant 2 : index
    %c0_5 = arith.constant 0 : index
    %4 = vector.load %arg2[%c2, %c0_5] : memref<256x192xf32, #tpu.memory_space<vmem>>, vector<1x192xf32>
    %5 = vector.extract_strided_slice %1 {offsets = [0, 0], sizes = [64, 1], strides = [1, 1]} : vector<64x2xf32> to vector<64x1xf32>
    %6 = vector.broadcast %5 : vector<64x1xf32> to vector<64x192xf32>
    %7 = vector.broadcast %2 : vector<1x192xf32> to vector<64x192xf32>
    %8 = arith.mulf %6, %7 : vector<64x192xf32>
    %9 = vector.extract_strided_slice %1 {offsets = [0, 1], sizes = [64, 1], strides = [1, 1]} : vector<64x2xf32> to vector<64x1xf32>
    %10 = vector.broadcast %9 : vector<64x1xf32> to vector<64x192xf32>
    %11 = vector.broadcast %3 : vector<1x192xf32> to vector<64x192xf32>
    %12 = arith.mulf %10, %11 : vector<64x192xf32>
    %13 = arith.addf %8, %12 : vector<64x192xf32>
    %14 = vector.broadcast %4 : vector<1x192xf32> to vector<64x192xf32>
    %15 = arith.addf %13, %14 : vector<64x192xf32>
    %c8 = arith.constant 8 : index
    %c0_6 = arith.constant 0 : index
    %16 = vector.load %arg2[%c8, %c0_6] : memref<256x192xf32, #tpu.memory_space<vmem>>, vector<64x192xf32>
    %c3 = arith.constant 3 : index
    %c0_7 = arith.constant 0 : index
    %17 = vector.load %arg2[%c3, %c0_7] : memref<256x192xf32, #tpu.memory_space<vmem>>, vector<1x192xf32>
    %18 = vector.shape_cast %17 : vector<1x192xf32> to vector<1x192xf32>
    %19 = vector.broadcast %18 : vector<1x192xf32> to vector<8x192xf32>
    %cst = arith.constant 0.000000e+00 : f32
    %20 = vector.broadcast %cst : f32 to vector<8x64xf32>
    %21 = vector.extract_strided_slice %15 {offsets = [0, 0], sizes = [8, 192], strides = [1, 1]} : vector<64x192xf32> to vector<8x192xf32>
    %cst_8 = arith.constant dense<0.000000e+00> : vector<8x192xf32>
    %22 = tpu.matmul %20, %16, %cst_8 {dimension_numbers = #tpu.dot_dimension_numbers<[1], [0], [0], [1], [0, 0, 1, 1], [], []>} : vector<8x64xf32>, vector<64x192xf32>, vector<8x192xf32> -> vector<8x192xf32>
    %23 = arith.addf %22, %19 : vector<8x192xf32>
    %24 = vector.extract_strided_slice %21 {offsets = [0, 0], sizes = [8, 128], strides = [1, 1]} : vector<8x192xf32> to vector<8x128xf32>
    %25 = vector.extract_strided_slice %23 {offsets = [0, 0], sizes = [8, 128], strides = [1, 1]} : vector<8x192xf32> to vector<8x128xf32>
    %26 = arith.addf %24, %25 : vector<8x128xf32>
    %27 = arith.negf %26 : vector<8x128xf32>
    %28 = math.exp %27 : vector<8x128xf32>
    %cst_9 = arith.constant 1.000000e+00 : f32
    %29 = vector.broadcast %cst_9 : f32 to vector<8x128xf32>
    %30 = arith.addf %29, %28 : vector<8x128xf32>
    %31 = arith.divf %29, %30 : vector<8x128xf32>
    %32 = vector.extract_strided_slice %31 {offsets = [0, 0], sizes = [8, 64], strides = [1, 1]} : vector<8x128xf32> to vector<8x64xf32>
    %33 = vector.extract_strided_slice %31 {offsets = [0, 64], sizes = [8, 64], strides = [1, 1]} : vector<8x128xf32> to vector<8x64xf32>
    %34 = vector.extract_strided_slice %21 {offsets = [0, 128], sizes = [8, 64], strides = [1, 1]} : vector<8x192xf32> to vector<8x64xf32>
    %35 = vector.extract_strided_slice %23 {offsets = [0, 128], sizes = [8, 64], strides = [1, 1]} : vector<8x192xf32> to vector<8x64xf32>
    %36 = arith.mulf %32, %35 : vector<8x64xf32>
    %37 = arith.addf %34, %36 : vector<8x64xf32>
    %38 = math.tanh %37 : vector<8x64xf32>
    %cst_10 = arith.constant 1.000000e+00 : f32
    %39 = vector.broadcast %cst_10 : f32 to vector<8x64xf32>
    %40 = arith.subf %39, %33 : vector<8x64xf32>
    %41 = arith.mulf %40, %38 : vector<8x64xf32>
    %42 = arith.mulf %33, %20 : vector<8x64xf32>
    %43 = arith.addf %41, %42 : vector<8x64xf32>
    %44 = vector.extract_strided_slice %15 {offsets = [8, 0], sizes = [8, 192], strides = [1, 1]} : vector<64x192xf32> to vector<8x192xf32>
    %cst_11 = arith.constant dense<0.000000e+00> : vector<8x192xf32>
    %45 = tpu.matmul %43, %16, %cst_11 {dimension_numbers = #tpu.dot_dimension_numbers<[1], [0], [0], [1], [0, 0, 1, 1], [], []>} : vector<8x64xf32>, vector<64x192xf32>, vector<8x192xf32> -> vector<8x192xf32>
    %46 = arith.addf %45, %19 : vector<8x192xf32>
    %47 = vector.extract_strided_slice %44 {offsets = [0, 0], sizes = [8, 128], strides = [1, 1]} : vector<8x192xf32> to vector<8x128xf32>
    %48 = vector.extract_strided_slice %46 {offsets = [0, 0], sizes = [8, 128], strides = [1, 1]} : vector<8x192xf32> to vector<8x128xf32>
    %49 = arith.addf %47, %48 : vector<8x128xf32>
    %50 = arith.negf %49 : vector<8x128xf32>
    %51 = math.exp %50 : vector<8x128xf32>
    %cst_12 = arith.constant 1.000000e+00 : f32
    %52 = vector.broadcast %cst_12 : f32 to vector<8x128xf32>
    %53 = arith.addf %52, %51 : vector<8x128xf32>
    %54 = arith.divf %52, %53 : vector<8x128xf32>
    %55 = vector.extract_strided_slice %54 {offsets = [0, 0], sizes = [8, 64], strides = [1, 1]} : vector<8x128xf32> to vector<8x64xf32>
    %56 = vector.extract_strided_slice %54 {offsets = [0, 64], sizes = [8, 64], strides = [1, 1]} : vector<8x128xf32> to vector<8x64xf32>
    %57 = vector.extract_strided_slice %44 {offsets = [0, 128], sizes = [8, 64], strides = [1, 1]} : vector<8x192xf32> to vector<8x64xf32>
    %58 = vector.extract_strided_slice %46 {offsets = [0, 128], sizes = [8, 64], strides = [1, 1]} : vector<8x192xf32> to vector<8x64xf32>
    %59 = arith.mulf %55, %58 : vector<8x64xf32>
    %60 = arith.addf %57, %59 : vector<8x64xf32>
    %61 = math.tanh %60 : vector<8x64xf32>
    %cst_13 = arith.constant 1.000000e+00 : f32
    %62 = vector.broadcast %cst_13 : f32 to vector<8x64xf32>
    %63 = arith.subf %62, %56 : vector<8x64xf32>
    %64 = arith.mulf %63, %61 : vector<8x64xf32>
    %65 = arith.mulf %56, %43 : vector<8x64xf32>
    %66 = arith.addf %64, %65 : vector<8x64xf32>
    %67 = vector.extract_strided_slice %15 {offsets = [16, 0], sizes = [8, 192], strides = [1, 1]} : vector<64x192xf32> to vector<8x192xf32>
    %cst_14 = arith.constant dense<0.000000e+00> : vector<8x192xf32>
    %68 = tpu.matmul %66, %16, %cst_14 {dimension_numbers = #tpu.dot_dimension_numbers<[1], [0], [0], [1], [0, 0, 1, 1], [], []>} : vector<8x64xf32>, vector<64x192xf32>, vector<8x192xf32> -> vector<8x192xf32>
    %69 = arith.addf %68, %19 : vector<8x192xf32>
    %70 = vector.extract_strided_slice %67 {offsets = [0, 0], sizes = [8, 128], strides = [1, 1]} : vector<8x192xf32> to vector<8x128xf32>
    %71 = vector.extract_strided_slice %69 {offsets = [0, 0], sizes = [8, 128], strides = [1, 1]} : vector<8x192xf32> to vector<8x128xf32>
    %72 = arith.addf %70, %71 : vector<8x128xf32>
    %73 = arith.negf %72 : vector<8x128xf32>
    %74 = math.exp %73 : vector<8x128xf32>
    %cst_15 = arith.constant 1.000000e+00 : f32
    %75 = vector.broadcast %cst_15 : f32 to vector<8x128xf32>
    %76 = arith.addf %75, %74 : vector<8x128xf32>
    %77 = arith.divf %75, %76 : vector<8x128xf32>
    %78 = vector.extract_strided_slice %77 {offsets = [0, 0], sizes = [8, 64], strides = [1, 1]} : vector<8x128xf32> to vector<8x64xf32>
    %79 = vector.extract_strided_slice %77 {offsets = [0, 64], sizes = [8, 64], strides = [1, 1]} : vector<8x128xf32> to vector<8x64xf32>
    %80 = vector.extract_strided_slice %67 {offsets = [0, 128], sizes = [8, 64], strides = [1, 1]} : vector<8x192xf32> to vector<8x64xf32>
    %81 = vector.extract_strided_slice %69 {offsets = [0, 128], sizes = [8, 64], strides = [1, 1]} : vector<8x192xf32> to vector<8x64xf32>
    %82 = arith.mulf %78, %81 : vector<8x64xf32>
    %83 = arith.addf %80, %82 : vector<8x64xf32>
    %84 = math.tanh %83 : vector<8x64xf32>
    %cst_16 = arith.constant 1.000000e+00 : f32
    %85 = vector.broadcast %cst_16 : f32 to vector<8x64xf32>
    %86 = arith.subf %85, %79 : vector<8x64xf32>
    %87 = arith.mulf %86, %84 : vector<8x64xf32>
    %88 = arith.mulf %79, %66 : vector<8x64xf32>
    %89 = arith.addf %87, %88 : vector<8x64xf32>
    %90 = vector.extract_strided_slice %15 {offsets = [24, 0], sizes = [8, 192], strides = [1, 1]} : vector<64x192xf32> to vector<8x192xf32>
    %cst_17 = arith.constant dense<0.000000e+00> : vector<8x192xf32>
    %91 = tpu.matmul %89, %16, %cst_17 {dimension_numbers = #tpu.dot_dimension_numbers<[1], [0], [0], [1], [0, 0, 1, 1], [], []>} : vector<8x64xf32>, vector<64x192xf32>, vector<8x192xf32> -> vector<8x192xf32>
    %92 = arith.addf %91, %19 : vector<8x192xf32>
    %93 = vector.extract_strided_slice %90 {offsets = [0, 0], sizes = [8, 128], strides = [1, 1]} : vector<8x192xf32> to vector<8x128xf32>
    %94 = vector.extract_strided_slice %92 {offsets = [0, 0], sizes = [8, 128], strides = [1, 1]} : vector<8x192xf32> to vector<8x128xf32>
    %95 = arith.addf %93, %94 : vector<8x128xf32>
    %96 = arith.negf %95 : vector<8x128xf32>
    %97 = math.exp %96 : vector<8x128xf32>
    %cst_18 = arith.constant 1.000000e+00 : f32
    %98 = vector.broadcast %cst_18 : f32 to vector<8x128xf32>
    %99 = arith.addf %98, %97 : vector<8x128xf32>
    %100 = arith.divf %98, %99 : vector<8x128xf32>
    %101 = vector.extract_strided_slice %100 {offsets = [0, 0], sizes = [8, 64], strides = [1, 1]} : vector<8x128xf32> to vector<8x64xf32>
    %102 = vector.extract_strided_slice %100 {offsets = [0, 64], sizes = [8, 64], strides = [1, 1]} : vector<8x128xf32> to vector<8x64xf32>
    %103 = vector.extract_strided_slice %90 {offsets = [0, 128], sizes = [8, 64], strides = [1, 1]} : vector<8x192xf32> to vector<8x64xf32>
    %104 = vector.extract_strided_slice %92 {offsets = [0, 128], sizes = [8, 64], strides = [1, 1]} : vector<8x192xf32> to vector<8x64xf32>
    %105 = arith.mulf %101, %104 : vector<8x64xf32>
    %106 = arith.addf %103, %105 : vector<8x64xf32>
    %107 = math.tanh %106 : vector<8x64xf32>
    %cst_19 = arith.constant 1.000000e+00 : f32
    %108 = vector.broadcast %cst_19 : f32 to vector<8x64xf32>
    %109 = arith.subf %108, %102 : vector<8x64xf32>
    %110 = arith.mulf %109, %107 : vector<8x64xf32>
    %111 = arith.mulf %102, %89 : vector<8x64xf32>
    %112 = arith.addf %110, %111 : vector<8x64xf32>
    %113 = vector.extract_strided_slice %15 {offsets = [32, 0], sizes = [8, 192], strides = [1, 1]} : vector<64x192xf32> to vector<8x192xf32>
    %cst_20 = arith.constant dense<0.000000e+00> : vector<8x192xf32>
    %114 = tpu.matmul %112, %16, %cst_20 {dimension_numbers = #tpu.dot_dimension_numbers<[1], [0], [0], [1], [0, 0, 1, 1], [], []>} : vector<8x64xf32>, vector<64x192xf32>, vector<8x192xf32> -> vector<8x192xf32>
    %115 = arith.addf %114, %19 : vector<8x192xf32>
    %116 = vector.extract_strided_slice %113 {offsets = [0, 0], sizes = [8, 128], strides = [1, 1]} : vector<8x192xf32> to vector<8x128xf32>
    %117 = vector.extract_strided_slice %115 {offsets = [0, 0], sizes = [8, 128], strides = [1, 1]} : vector<8x192xf32> to vector<8x128xf32>
    %118 = arith.addf %116, %117 : vector<8x128xf32>
    %119 = arith.negf %118 : vector<8x128xf32>
    %120 = math.exp %119 : vector<8x128xf32>
    %cst_21 = arith.constant 1.000000e+00 : f32
    %121 = vector.broadcast %cst_21 : f32 to vector<8x128xf32>
    %122 = arith.addf %121, %120 : vector<8x128xf32>
    %123 = arith.divf %121, %122 : vector<8x128xf32>
    %124 = vector.extract_strided_slice %123 {offsets = [0, 0], sizes = [8, 64], strides = [1, 1]} : vector<8x128xf32> to vector<8x64xf32>
    %125 = vector.extract_strided_slice %123 {offsets = [0, 64], sizes = [8, 64], strides = [1, 1]} : vector<8x128xf32> to vector<8x64xf32>
    %126 = vector.extract_strided_slice %113 {offsets = [0, 128], sizes = [8, 64], strides = [1, 1]} : vector<8x192xf32> to vector<8x64xf32>
    %127 = vector.extract_strided_slice %115 {offsets = [0, 128], sizes = [8, 64], strides = [1, 1]} : vector<8x192xf32> to vector<8x64xf32>
    %128 = arith.mulf %124, %127 : vector<8x64xf32>
    %129 = arith.addf %126, %128 : vector<8x64xf32>
    %130 = math.tanh %129 : vector<8x64xf32>
    %cst_22 = arith.constant 1.000000e+00 : f32
    %131 = vector.broadcast %cst_22 : f32 to vector<8x64xf32>
    %132 = arith.subf %131, %125 : vector<8x64xf32>
    %133 = arith.mulf %132, %130 : vector<8x64xf32>
    %134 = arith.mulf %125, %112 : vector<8x64xf32>
    %135 = arith.addf %133, %134 : vector<8x64xf32>
    %136 = vector.extract_strided_slice %15 {offsets = [40, 0], sizes = [8, 192], strides = [1, 1]} : vector<64x192xf32> to vector<8x192xf32>
    %cst_23 = arith.constant dense<0.000000e+00> : vector<8x192xf32>
    %137 = tpu.matmul %135, %16, %cst_23 {dimension_numbers = #tpu.dot_dimension_numbers<[1], [0], [0], [1], [0, 0, 1, 1], [], []>} : vector<8x64xf32>, vector<64x192xf32>, vector<8x192xf32> -> vector<8x192xf32>
    %138 = arith.addf %137, %19 : vector<8x192xf32>
    %139 = vector.extract_strided_slice %136 {offsets = [0, 0], sizes = [8, 128], strides = [1, 1]} : vector<8x192xf32> to vector<8x128xf32>
    %140 = vector.extract_strided_slice %138 {offsets = [0, 0], sizes = [8, 128], strides = [1, 1]} : vector<8x192xf32> to vector<8x128xf32>
    %141 = arith.addf %139, %140 : vector<8x128xf32>
    %142 = arith.negf %141 : vector<8x128xf32>
    %143 = math.exp %142 : vector<8x128xf32>
    %cst_24 = arith.constant 1.000000e+00 : f32
    %144 = vector.broadcast %cst_24 : f32 to vector<8x128xf32>
    %145 = arith.addf %144, %143 : vector<8x128xf32>
    %146 = arith.divf %144, %145 : vector<8x128xf32>
    %147 = vector.extract_strided_slice %146 {offsets = [0, 0], sizes = [8, 64], strides = [1, 1]} : vector<8x128xf32> to vector<8x64xf32>
    %148 = vector.extract_strided_slice %146 {offsets = [0, 64], sizes = [8, 64], strides = [1, 1]} : vector<8x128xf32> to vector<8x64xf32>
    %149 = vector.extract_strided_slice %136 {offsets = [0, 128], sizes = [8, 64], strides = [1, 1]} : vector<8x192xf32> to vector<8x64xf32>
    %150 = vector.extract_strided_slice %138 {offsets = [0, 128], sizes = [8, 64], strides = [1, 1]} : vector<8x192xf32> to vector<8x64xf32>
    %151 = arith.mulf %147, %150 : vector<8x64xf32>
    %152 = arith.addf %149, %151 : vector<8x64xf32>
    %153 = math.tanh %152 : vector<8x64xf32>
    %cst_25 = arith.constant 1.000000e+00 : f32
    %154 = vector.broadcast %cst_25 : f32 to vector<8x64xf32>
    %155 = arith.subf %154, %148 : vector<8x64xf32>
    %156 = arith.mulf %155, %153 : vector<8x64xf32>
    %157 = arith.mulf %148, %135 : vector<8x64xf32>
    %158 = arith.addf %156, %157 : vector<8x64xf32>
    %159 = vector.extract_strided_slice %15 {offsets = [48, 0], sizes = [8, 192], strides = [1, 1]} : vector<64x192xf32> to vector<8x192xf32>
    %cst_26 = arith.constant dense<0.000000e+00> : vector<8x192xf32>
    %160 = tpu.matmul %158, %16, %cst_26 {dimension_numbers = #tpu.dot_dimension_numbers<[1], [0], [0], [1], [0, 0, 1, 1], [], []>} : vector<8x64xf32>, vector<64x192xf32>, vector<8x192xf32> -> vector<8x192xf32>
    %161 = arith.addf %160, %19 : vector<8x192xf32>
    %162 = vector.extract_strided_slice %159 {offsets = [0, 0], sizes = [8, 128], strides = [1, 1]} : vector<8x192xf32> to vector<8x128xf32>
    %163 = vector.extract_strided_slice %161 {offsets = [0, 0], sizes = [8, 128], strides = [1, 1]} : vector<8x192xf32> to vector<8x128xf32>
    %164 = arith.addf %162, %163 : vector<8x128xf32>
    %165 = arith.negf %164 : vector<8x128xf32>
    %166 = math.exp %165 : vector<8x128xf32>
    %cst_27 = arith.constant 1.000000e+00 : f32
    %167 = vector.broadcast %cst_27 : f32 to vector<8x128xf32>
    %168 = arith.addf %167, %166 : vector<8x128xf32>
    %169 = arith.divf %167, %168 : vector<8x128xf32>
    %170 = vector.extract_strided_slice %169 {offsets = [0, 0], sizes = [8, 64], strides = [1, 1]} : vector<8x128xf32> to vector<8x64xf32>
    %171 = vector.extract_strided_slice %169 {offsets = [0, 64], sizes = [8, 64], strides = [1, 1]} : vector<8x128xf32> to vector<8x64xf32>
    %172 = vector.extract_strided_slice %159 {offsets = [0, 128], sizes = [8, 64], strides = [1, 1]} : vector<8x192xf32> to vector<8x64xf32>
    %173 = vector.extract_strided_slice %161 {offsets = [0, 128], sizes = [8, 64], strides = [1, 1]} : vector<8x192xf32> to vector<8x64xf32>
    %174 = arith.mulf %170, %173 : vector<8x64xf32>
    %175 = arith.addf %172, %174 : vector<8x64xf32>
    %176 = math.tanh %175 : vector<8x64xf32>
    %cst_28 = arith.constant 1.000000e+00 : f32
    %177 = vector.broadcast %cst_28 : f32 to vector<8x64xf32>
    %178 = arith.subf %177, %171 : vector<8x64xf32>
    %179 = arith.mulf %178, %176 : vector<8x64xf32>
    %180 = arith.mulf %171, %158 : vector<8x64xf32>
    %181 = arith.addf %179, %180 : vector<8x64xf32>
    %182 = vector.extract_strided_slice %15 {offsets = [56, 0], sizes = [8, 192], strides = [1, 1]} : vector<64x192xf32> to vector<8x192xf32>
    %cst_29 = arith.constant dense<0.000000e+00> : vector<8x192xf32>
    %183 = tpu.matmul %181, %16, %cst_29 {dimension_numbers = #tpu.dot_dimension_numbers<[1], [0], [0], [1], [0, 0, 1, 1], [], []>} : vector<8x64xf32>, vector<64x192xf32>, vector<8x192xf32> -> vector<8x192xf32>
    %184 = arith.addf %183, %19 : vector<8x192xf32>
    %185 = vector.extract_strided_slice %182 {offsets = [0, 0], sizes = [8, 128], strides = [1, 1]} : vector<8x192xf32> to vector<8x128xf32>
    %186 = vector.extract_strided_slice %184 {offsets = [0, 0], sizes = [8, 128], strides = [1, 1]} : vector<8x192xf32> to vector<8x128xf32>
    %187 = arith.addf %185, %186 : vector<8x128xf32>
    %188 = arith.negf %187 : vector<8x128xf32>
    %189 = math.exp %188 : vector<8x128xf32>
    %cst_30 = arith.constant 1.000000e+00 : f32
    %190 = vector.broadcast %cst_30 : f32 to vector<8x128xf32>
    %191 = arith.addf %190, %189 : vector<8x128xf32>
    %192 = arith.divf %190, %191 : vector<8x128xf32>
    %193 = vector.extract_strided_slice %192 {offsets = [0, 0], sizes = [8, 64], strides = [1, 1]} : vector<8x128xf32> to vector<8x64xf32>
    %194 = vector.extract_strided_slice %192 {offsets = [0, 64], sizes = [8, 64], strides = [1, 1]} : vector<8x128xf32> to vector<8x64xf32>
    %195 = vector.extract_strided_slice %182 {offsets = [0, 128], sizes = [8, 64], strides = [1, 1]} : vector<8x192xf32> to vector<8x64xf32>
    %196 = vector.extract_strided_slice %184 {offsets = [0, 128], sizes = [8, 64], strides = [1, 1]} : vector<8x192xf32> to vector<8x64xf32>
    %197 = arith.mulf %193, %196 : vector<8x64xf32>
    %198 = arith.addf %195, %197 : vector<8x64xf32>
    %199 = math.tanh %198 : vector<8x64xf32>
    %cst_31 = arith.constant 1.000000e+00 : f32
    %200 = vector.broadcast %cst_31 : f32 to vector<8x64xf32>
    %201 = arith.subf %200, %194 : vector<8x64xf32>
    %202 = arith.mulf %201, %199 : vector<8x64xf32>
    %203 = arith.mulf %194, %181 : vector<8x64xf32>
    %204 = arith.addf %202, %203 : vector<8x64xf32>
    %205 = vector.extract_strided_slice %43 {offsets = [0, 0], sizes = [8, 32], strides = [1, 1]} : vector<8x64xf32> to vector<8x32xf32>
    %206 = vector.extract_strided_slice %204 {offsets = [0, 32], sizes = [8, 32], strides = [1, 1]} : vector<8x64xf32> to vector<8x32xf32>
    %207 = arith.addf %205, %206 : vector<8x32xf32>
    %208 = vector.extract_strided_slice %66 {offsets = [0, 0], sizes = [8, 32], strides = [1, 1]} : vector<8x64xf32> to vector<8x32xf32>
    %209 = vector.extract_strided_slice %181 {offsets = [0, 32], sizes = [8, 32], strides = [1, 1]} : vector<8x64xf32> to vector<8x32xf32>
    %210 = arith.addf %208, %209 : vector<8x32xf32>
    %211 = vector.extract_strided_slice %89 {offsets = [0, 0], sizes = [8, 32], strides = [1, 1]} : vector<8x64xf32> to vector<8x32xf32>
    %212 = vector.extract_strided_slice %158 {offsets = [0, 32], sizes = [8, 32], strides = [1, 1]} : vector<8x64xf32> to vector<8x32xf32>
    %213 = arith.addf %211, %212 : vector<8x32xf32>
    %214 = vector.extract_strided_slice %112 {offsets = [0, 0], sizes = [8, 32], strides = [1, 1]} : vector<8x64xf32> to vector<8x32xf32>
    %215 = vector.extract_strided_slice %135 {offsets = [0, 32], sizes = [8, 32], strides = [1, 1]} : vector<8x64xf32> to vector<8x32xf32>
    %216 = arith.addf %214, %215 : vector<8x32xf32>
    %217 = vector.extract_strided_slice %135 {offsets = [0, 0], sizes = [8, 32], strides = [1, 1]} : vector<8x64xf32> to vector<8x32xf32>
    %218 = vector.extract_strided_slice %112 {offsets = [0, 32], sizes = [8, 32], strides = [1, 1]} : vector<8x64xf32> to vector<8x32xf32>
    %219 = arith.addf %217, %218 : vector<8x32xf32>
    %220 = vector.extract_strided_slice %158 {offsets = [0, 0], sizes = [8, 32], strides = [1, 1]} : vector<8x64xf32> to vector<8x32xf32>
    %221 = vector.extract_strided_slice %89 {offsets = [0, 32], sizes = [8, 32], strides = [1, 1]} : vector<8x64xf32> to vector<8x32xf32>
    %222 = arith.addf %220, %221 : vector<8x32xf32>
    %223 = vector.extract_strided_slice %181 {offsets = [0, 0], sizes = [8, 32], strides = [1, 1]} : vector<8x64xf32> to vector<8x32xf32>
    %224 = vector.extract_strided_slice %66 {offsets = [0, 32], sizes = [8, 32], strides = [1, 1]} : vector<8x64xf32> to vector<8x32xf32>
    %225 = arith.addf %223, %224 : vector<8x32xf32>
    %226 = vector.extract_strided_slice %204 {offsets = [0, 0], sizes = [8, 32], strides = [1, 1]} : vector<8x64xf32> to vector<8x32xf32>
    %227 = vector.extract_strided_slice %43 {offsets = [0, 32], sizes = [8, 32], strides = [1, 1]} : vector<8x64xf32> to vector<8x32xf32>
    %228 = arith.addf %226, %227 : vector<8x32xf32>
    %229 = tpu.concatenate %207, %210, %213, %216, %219, %222, %225, %228 in 0 : vector<8x32xf32>, vector<8x32xf32>, vector<8x32xf32>, vector<8x32xf32>, vector<8x32xf32>, vector<8x32xf32>, vector<8x32xf32>, vector<8x32xf32> -> vector<64x32xf32>
    %c72 = arith.constant 72 : index
    %c0_32 = arith.constant 0 : index
    %230 = vector.load %arg2[%c72, %c0_32] : memref<256x192xf32, #tpu.memory_space<vmem>>, vector<32x192xf32>
    %c104 = arith.constant 104 : index
    %c0_33 = arith.constant 0 : index
    %231 = vector.load %arg2[%c104, %c0_33] : memref<256x192xf32, #tpu.memory_space<vmem>>, vector<32x192xf32>
    %c4 = arith.constant 4 : index
    %c0_34 = arith.constant 0 : index
    %232 = vector.load %arg2[%c4, %c0_34] : memref<256x192xf32, #tpu.memory_space<vmem>>, vector<1x192xf32>
    %cst_35 = arith.constant dense<0.000000e+00> : vector<64x192xf32>
    %233 = tpu.matmul %229, %230, %cst_35 {dimension_numbers = #tpu.dot_dimension_numbers<[1], [0], [0], [1], [0, 0, 1, 1], [], []>} : vector<64x32xf32>, vector<32x192xf32>, vector<64x192xf32> -> vector<64x192xf32>
    %234 = vector.broadcast %232 : vector<1x192xf32> to vector<64x192xf32>
    %235 = arith.addf %233, %234 : vector<64x192xf32>
    %cst_36 = arith.constant dense<0.000000e+00> : vector<64x192xf32>
    %236 = tpu.matmul %229, %231, %cst_36 {dimension_numbers = #tpu.dot_dimension_numbers<[1], [0], [0], [1], [0, 0, 1, 1], [], []>} : vector<64x32xf32>, vector<32x192xf32>, vector<64x192xf32> -> vector<64x192xf32>
    %c136 = arith.constant 136 : index
    %c0_37 = arith.constant 0 : index
    %237 = vector.load %arg2[%c136, %c0_37] : memref<256x192xf32, #tpu.memory_space<vmem>>, vector<64x192xf32>
    %c5 = arith.constant 5 : index
    %c0_38 = arith.constant 0 : index
    %238 = vector.load %arg2[%c5, %c0_38] : memref<256x192xf32, #tpu.memory_space<vmem>>, vector<1x192xf32>
    %239 = vector.shape_cast %238 : vector<1x192xf32> to vector<1x192xf32>
    %240 = vector.broadcast %239 : vector<1x192xf32> to vector<8x192xf32>
    %cst_39 = arith.constant 0.000000e+00 : f32
    %241 = vector.broadcast %cst_39 : f32 to vector<8x64xf32>
    %242 = vector.extract_strided_slice %235 {offsets = [0, 0], sizes = [8, 192], strides = [1, 1]} : vector<64x192xf32> to vector<8x192xf32>
    %243 = vector.extract_strided_slice %236 {offsets = [56, 0], sizes = [8, 192], strides = [1, 1]} : vector<64x192xf32> to vector<8x192xf32>
    %244 = arith.addf %242, %243 : vector<8x192xf32>
    %cst_40 = arith.constant dense<0.000000e+00> : vector<8x192xf32>
    %245 = tpu.matmul %241, %237, %cst_40 {dimension_numbers = #tpu.dot_dimension_numbers<[1], [0], [0], [1], [0, 0, 1, 1], [], []>} : vector<8x64xf32>, vector<64x192xf32>, vector<8x192xf32> -> vector<8x192xf32>
    %246 = arith.addf %245, %240 : vector<8x192xf32>
    %247 = vector.extract_strided_slice %244 {offsets = [0, 0], sizes = [8, 128], strides = [1, 1]} : vector<8x192xf32> to vector<8x128xf32>
    %248 = vector.extract_strided_slice %246 {offsets = [0, 0], sizes = [8, 128], strides = [1, 1]} : vector<8x192xf32> to vector<8x128xf32>
    %249 = arith.addf %247, %248 : vector<8x128xf32>
    %250 = arith.negf %249 : vector<8x128xf32>
    %251 = math.exp %250 : vector<8x128xf32>
    %cst_41 = arith.constant 1.000000e+00 : f32
    %252 = vector.broadcast %cst_41 : f32 to vector<8x128xf32>
    %253 = arith.addf %252, %251 : vector<8x128xf32>
    %254 = arith.divf %252, %253 : vector<8x128xf32>
    %255 = vector.extract_strided_slice %254 {offsets = [0, 0], sizes = [8, 64], strides = [1, 1]} : vector<8x128xf32> to vector<8x64xf32>
    %256 = vector.extract_strided_slice %254 {offsets = [0, 64], sizes = [8, 64], strides = [1, 1]} : vector<8x128xf32> to vector<8x64xf32>
    %257 = vector.extract_strided_slice %244 {offsets = [0, 128], sizes = [8, 64], strides = [1, 1]} : vector<8x192xf32> to vector<8x64xf32>
    %258 = vector.extract_strided_slice %246 {offsets = [0, 128], sizes = [8, 64], strides = [1, 1]} : vector<8x192xf32> to vector<8x64xf32>
    %259 = arith.mulf %255, %258 : vector<8x64xf32>
    %260 = arith.addf %257, %259 : vector<8x64xf32>
    %261 = math.tanh %260 : vector<8x64xf32>
    %cst_42 = arith.constant 1.000000e+00 : f32
    %262 = vector.broadcast %cst_42 : f32 to vector<8x64xf32>
    %263 = arith.subf %262, %256 : vector<8x64xf32>
    %264 = arith.mulf %263, %261 : vector<8x64xf32>
    %265 = arith.mulf %256, %241 : vector<8x64xf32>
    %266 = arith.addf %264, %265 : vector<8x64xf32>
    %267 = vector.extract_strided_slice %235 {offsets = [8, 0], sizes = [8, 192], strides = [1, 1]} : vector<64x192xf32> to vector<8x192xf32>
    %268 = vector.extract_strided_slice %236 {offsets = [48, 0], sizes = [8, 192], strides = [1, 1]} : vector<64x192xf32> to vector<8x192xf32>
    %269 = arith.addf %267, %268 : vector<8x192xf32>
    %cst_43 = arith.constant dense<0.000000e+00> : vector<8x192xf32>
    %270 = tpu.matmul %266, %237, %cst_43 {dimension_numbers = #tpu.dot_dimension_numbers<[1], [0], [0], [1], [0, 0, 1, 1], [], []>} : vector<8x64xf32>, vector<64x192xf32>, vector<8x192xf32> -> vector<8x192xf32>
    %271 = arith.addf %270, %240 : vector<8x192xf32>
    %272 = vector.extract_strided_slice %269 {offsets = [0, 0], sizes = [8, 128], strides = [1, 1]} : vector<8x192xf32> to vector<8x128xf32>
    %273 = vector.extract_strided_slice %271 {offsets = [0, 0], sizes = [8, 128], strides = [1, 1]} : vector<8x192xf32> to vector<8x128xf32>
    %274 = arith.addf %272, %273 : vector<8x128xf32>
    %275 = arith.negf %274 : vector<8x128xf32>
    %276 = math.exp %275 : vector<8x128xf32>
    %cst_44 = arith.constant 1.000000e+00 : f32
    %277 = vector.broadcast %cst_44 : f32 to vector<8x128xf32>
    %278 = arith.addf %277, %276 : vector<8x128xf32>
    %279 = arith.divf %277, %278 : vector<8x128xf32>
    %280 = vector.extract_strided_slice %279 {offsets = [0, 0], sizes = [8, 64], strides = [1, 1]} : vector<8x128xf32> to vector<8x64xf32>
    %281 = vector.extract_strided_slice %279 {offsets = [0, 64], sizes = [8, 64], strides = [1, 1]} : vector<8x128xf32> to vector<8x64xf32>
    %282 = vector.extract_strided_slice %269 {offsets = [0, 128], sizes = [8, 64], strides = [1, 1]} : vector<8x192xf32> to vector<8x64xf32>
    %283 = vector.extract_strided_slice %271 {offsets = [0, 128], sizes = [8, 64], strides = [1, 1]} : vector<8x192xf32> to vector<8x64xf32>
    %284 = arith.mulf %280, %283 : vector<8x64xf32>
    %285 = arith.addf %282, %284 : vector<8x64xf32>
    %286 = math.tanh %285 : vector<8x64xf32>
    %cst_45 = arith.constant 1.000000e+00 : f32
    %287 = vector.broadcast %cst_45 : f32 to vector<8x64xf32>
    %288 = arith.subf %287, %281 : vector<8x64xf32>
    %289 = arith.mulf %288, %286 : vector<8x64xf32>
    %290 = arith.mulf %281, %266 : vector<8x64xf32>
    %291 = arith.addf %289, %290 : vector<8x64xf32>
    %292 = vector.extract_strided_slice %235 {offsets = [16, 0], sizes = [8, 192], strides = [1, 1]} : vector<64x192xf32> to vector<8x192xf32>
    %293 = vector.extract_strided_slice %236 {offsets = [40, 0], sizes = [8, 192], strides = [1, 1]} : vector<64x192xf32> to vector<8x192xf32>
    %294 = arith.addf %292, %293 : vector<8x192xf32>
    %cst_46 = arith.constant dense<0.000000e+00> : vector<8x192xf32>
    %295 = tpu.matmul %291, %237, %cst_46 {dimension_numbers = #tpu.dot_dimension_numbers<[1], [0], [0], [1], [0, 0, 1, 1], [], []>} : vector<8x64xf32>, vector<64x192xf32>, vector<8x192xf32> -> vector<8x192xf32>
    %296 = arith.addf %295, %240 : vector<8x192xf32>
    %297 = vector.extract_strided_slice %294 {offsets = [0, 0], sizes = [8, 128], strides = [1, 1]} : vector<8x192xf32> to vector<8x128xf32>
    %298 = vector.extract_strided_slice %296 {offsets = [0, 0], sizes = [8, 128], strides = [1, 1]} : vector<8x192xf32> to vector<8x128xf32>
    %299 = arith.addf %297, %298 : vector<8x128xf32>
    %300 = arith.negf %299 : vector<8x128xf32>
    %301 = math.exp %300 : vector<8x128xf32>
    %cst_47 = arith.constant 1.000000e+00 : f32
    %302 = vector.broadcast %cst_47 : f32 to vector<8x128xf32>
    %303 = arith.addf %302, %301 : vector<8x128xf32>
    %304 = arith.divf %302, %303 : vector<8x128xf32>
    %305 = vector.extract_strided_slice %304 {offsets = [0, 0], sizes = [8, 64], strides = [1, 1]} : vector<8x128xf32> to vector<8x64xf32>
    %306 = vector.extract_strided_slice %304 {offsets = [0, 64], sizes = [8, 64], strides = [1, 1]} : vector<8x128xf32> to vector<8x64xf32>
    %307 = vector.extract_strided_slice %294 {offsets = [0, 128], sizes = [8, 64], strides = [1, 1]} : vector<8x192xf32> to vector<8x64xf32>
    %308 = vector.extract_strided_slice %296 {offsets = [0, 128], sizes = [8, 64], strides = [1, 1]} : vector<8x192xf32> to vector<8x64xf32>
    %309 = arith.mulf %305, %308 : vector<8x64xf32>
    %310 = arith.addf %307, %309 : vector<8x64xf32>
    %311 = math.tanh %310 : vector<8x64xf32>
    %cst_48 = arith.constant 1.000000e+00 : f32
    %312 = vector.broadcast %cst_48 : f32 to vector<8x64xf32>
    %313 = arith.subf %312, %306 : vector<8x64xf32>
    %314 = arith.mulf %313, %311 : vector<8x64xf32>
    %315 = arith.mulf %306, %291 : vector<8x64xf32>
    %316 = arith.addf %314, %315 : vector<8x64xf32>
    %317 = vector.extract_strided_slice %235 {offsets = [24, 0], sizes = [8, 192], strides = [1, 1]} : vector<64x192xf32> to vector<8x192xf32>
    %318 = vector.extract_strided_slice %236 {offsets = [32, 0], sizes = [8, 192], strides = [1, 1]} : vector<64x192xf32> to vector<8x192xf32>
    %319 = arith.addf %317, %318 : vector<8x192xf32>
    %cst_49 = arith.constant dense<0.000000e+00> : vector<8x192xf32>
    %320 = tpu.matmul %316, %237, %cst_49 {dimension_numbers = #tpu.dot_dimension_numbers<[1], [0], [0], [1], [0, 0, 1, 1], [], []>} : vector<8x64xf32>, vector<64x192xf32>, vector<8x192xf32> -> vector<8x192xf32>
    %321 = arith.addf %320, %240 : vector<8x192xf32>
    %322 = vector.extract_strided_slice %319 {offsets = [0, 0], sizes = [8, 128], strides = [1, 1]} : vector<8x192xf32> to vector<8x128xf32>
    %323 = vector.extract_strided_slice %321 {offsets = [0, 0], sizes = [8, 128], strides = [1, 1]} : vector<8x192xf32> to vector<8x128xf32>
    %324 = arith.addf %322, %323 : vector<8x128xf32>
    %325 = arith.negf %324 : vector<8x128xf32>
    %326 = math.exp %325 : vector<8x128xf32>
    %cst_50 = arith.constant 1.000000e+00 : f32
    %327 = vector.broadcast %cst_50 : f32 to vector<8x128xf32>
    %328 = arith.addf %327, %326 : vector<8x128xf32>
    %329 = arith.divf %327, %328 : vector<8x128xf32>
    %330 = vector.extract_strided_slice %329 {offsets = [0, 0], sizes = [8, 64], strides = [1, 1]} : vector<8x128xf32> to vector<8x64xf32>
    %331 = vector.extract_strided_slice %329 {offsets = [0, 64], sizes = [8, 64], strides = [1, 1]} : vector<8x128xf32> to vector<8x64xf32>
    %332 = vector.extract_strided_slice %319 {offsets = [0, 128], sizes = [8, 64], strides = [1, 1]} : vector<8x192xf32> to vector<8x64xf32>
    %333 = vector.extract_strided_slice %321 {offsets = [0, 128], sizes = [8, 64], strides = [1, 1]} : vector<8x192xf32> to vector<8x64xf32>
    %334 = arith.mulf %330, %333 : vector<8x64xf32>
    %335 = arith.addf %332, %334 : vector<8x64xf32>
    %336 = math.tanh %335 : vector<8x64xf32>
    %cst_51 = arith.constant 1.000000e+00 : f32
    %337 = vector.broadcast %cst_51 : f32 to vector<8x64xf32>
    %338 = arith.subf %337, %331 : vector<8x64xf32>
    %339 = arith.mulf %338, %336 : vector<8x64xf32>
    %340 = arith.mulf %331, %316 : vector<8x64xf32>
    %341 = arith.addf %339, %340 : vector<8x64xf32>
    %342 = vector.extract_strided_slice %235 {offsets = [32, 0], sizes = [8, 192], strides = [1, 1]} : vector<64x192xf32> to vector<8x192xf32>
    %343 = vector.extract_strided_slice %236 {offsets = [24, 0], sizes = [8, 192], strides = [1, 1]} : vector<64x192xf32> to vector<8x192xf32>
    %344 = arith.addf %342, %343 : vector<8x192xf32>
    %cst_52 = arith.constant dense<0.000000e+00> : vector<8x192xf32>
    %345 = tpu.matmul %341, %237, %cst_52 {dimension_numbers = #tpu.dot_dimension_numbers<[1], [0], [0], [1], [0, 0, 1, 1], [], []>} : vector<8x64xf32>, vector<64x192xf32>, vector<8x192xf32> -> vector<8x192xf32>
    %346 = arith.addf %345, %240 : vector<8x192xf32>
    %347 = vector.extract_strided_slice %344 {offsets = [0, 0], sizes = [8, 128], strides = [1, 1]} : vector<8x192xf32> to vector<8x128xf32>
    %348 = vector.extract_strided_slice %346 {offsets = [0, 0], sizes = [8, 128], strides = [1, 1]} : vector<8x192xf32> to vector<8x128xf32>
    %349 = arith.addf %347, %348 : vector<8x128xf32>
    %350 = arith.negf %349 : vector<8x128xf32>
    %351 = math.exp %350 : vector<8x128xf32>
    %cst_53 = arith.constant 1.000000e+00 : f32
    %352 = vector.broadcast %cst_53 : f32 to vector<8x128xf32>
    %353 = arith.addf %352, %351 : vector<8x128xf32>
    %354 = arith.divf %352, %353 : vector<8x128xf32>
    %355 = vector.extract_strided_slice %354 {offsets = [0, 0], sizes = [8, 64], strides = [1, 1]} : vector<8x128xf32> to vector<8x64xf32>
    %356 = vector.extract_strided_slice %354 {offsets = [0, 64], sizes = [8, 64], strides = [1, 1]} : vector<8x128xf32> to vector<8x64xf32>
    %357 = vector.extract_strided_slice %344 {offsets = [0, 128], sizes = [8, 64], strides = [1, 1]} : vector<8x192xf32> to vector<8x64xf32>
    %358 = vector.extract_strided_slice %346 {offsets = [0, 128], sizes = [8, 64], strides = [1, 1]} : vector<8x192xf32> to vector<8x64xf32>
    %359 = arith.mulf %355, %358 : vector<8x64xf32>
    %360 = arith.addf %357, %359 : vector<8x64xf32>
    %361 = math.tanh %360 : vector<8x64xf32>
    %cst_54 = arith.constant 1.000000e+00 : f32
    %362 = vector.broadcast %cst_54 : f32 to vector<8x64xf32>
    %363 = arith.subf %362, %356 : vector<8x64xf32>
    %364 = arith.mulf %363, %361 : vector<8x64xf32>
    %365 = arith.mulf %356, %341 : vector<8x64xf32>
    %366 = arith.addf %364, %365 : vector<8x64xf32>
    %367 = vector.extract_strided_slice %235 {offsets = [40, 0], sizes = [8, 192], strides = [1, 1]} : vector<64x192xf32> to vector<8x192xf32>
    %368 = vector.extract_strided_slice %236 {offsets = [16, 0], sizes = [8, 192], strides = [1, 1]} : vector<64x192xf32> to vector<8x192xf32>
    %369 = arith.addf %367, %368 : vector<8x192xf32>
    %cst_55 = arith.constant dense<0.000000e+00> : vector<8x192xf32>
    %370 = tpu.matmul %366, %237, %cst_55 {dimension_numbers = #tpu.dot_dimension_numbers<[1], [0], [0], [1], [0, 0, 1, 1], [], []>} : vector<8x64xf32>, vector<64x192xf32>, vector<8x192xf32> -> vector<8x192xf32>
    %371 = arith.addf %370, %240 : vector<8x192xf32>
    %372 = vector.extract_strided_slice %369 {offsets = [0, 0], sizes = [8, 128], strides = [1, 1]} : vector<8x192xf32> to vector<8x128xf32>
    %373 = vector.extract_strided_slice %371 {offsets = [0, 0], sizes = [8, 128], strides = [1, 1]} : vector<8x192xf32> to vector<8x128xf32>
    %374 = arith.addf %372, %373 : vector<8x128xf32>
    %375 = arith.negf %374 : vector<8x128xf32>
    %376 = math.exp %375 : vector<8x128xf32>
    %cst_56 = arith.constant 1.000000e+00 : f32
    %377 = vector.broadcast %cst_56 : f32 to vector<8x128xf32>
    %378 = arith.addf %377, %376 : vector<8x128xf32>
    %379 = arith.divf %377, %378 : vector<8x128xf32>
    %380 = vector.extract_strided_slice %379 {offsets = [0, 0], sizes = [8, 64], strides = [1, 1]} : vector<8x128xf32> to vector<8x64xf32>
    %381 = vector.extract_strided_slice %379 {offsets = [0, 64], sizes = [8, 64], strides = [1, 1]} : vector<8x128xf32> to vector<8x64xf32>
    %382 = vector.extract_strided_slice %369 {offsets = [0, 128], sizes = [8, 64], strides = [1, 1]} : vector<8x192xf32> to vector<8x64xf32>
    %383 = vector.extract_strided_slice %371 {offsets = [0, 128], sizes = [8, 64], strides = [1, 1]} : vector<8x192xf32> to vector<8x64xf32>
    %384 = arith.mulf %380, %383 : vector<8x64xf32>
    %385 = arith.addf %382, %384 : vector<8x64xf32>
    %386 = math.tanh %385 : vector<8x64xf32>
    %cst_57 = arith.constant 1.000000e+00 : f32
    %387 = vector.broadcast %cst_57 : f32 to vector<8x64xf32>
    %388 = arith.subf %387, %381 : vector<8x64xf32>
    %389 = arith.mulf %388, %386 : vector<8x64xf32>
    %390 = arith.mulf %381, %366 : vector<8x64xf32>
    %391 = arith.addf %389, %390 : vector<8x64xf32>
    %392 = vector.extract_strided_slice %235 {offsets = [48, 0], sizes = [8, 192], strides = [1, 1]} : vector<64x192xf32> to vector<8x192xf32>
    %393 = vector.extract_strided_slice %236 {offsets = [8, 0], sizes = [8, 192], strides = [1, 1]} : vector<64x192xf32> to vector<8x192xf32>
    %394 = arith.addf %392, %393 : vector<8x192xf32>
    %cst_58 = arith.constant dense<0.000000e+00> : vector<8x192xf32>
    %395 = tpu.matmul %391, %237, %cst_58 {dimension_numbers = #tpu.dot_dimension_numbers<[1], [0], [0], [1], [0, 0, 1, 1], [], []>} : vector<8x64xf32>, vector<64x192xf32>, vector<8x192xf32> -> vector<8x192xf32>
    %396 = arith.addf %395, %240 : vector<8x192xf32>
    %397 = vector.extract_strided_slice %394 {offsets = [0, 0], sizes = [8, 128], strides = [1, 1]} : vector<8x192xf32> to vector<8x128xf32>
    %398 = vector.extract_strided_slice %396 {offsets = [0, 0], sizes = [8, 128], strides = [1, 1]} : vector<8x192xf32> to vector<8x128xf32>
    %399 = arith.addf %397, %398 : vector<8x128xf32>
    %400 = arith.negf %399 : vector<8x128xf32>
    %401 = math.exp %400 : vector<8x128xf32>
    %cst_59 = arith.constant 1.000000e+00 : f32
    %402 = vector.broadcast %cst_59 : f32 to vector<8x128xf32>
    %403 = arith.addf %402, %401 : vector<8x128xf32>
    %404 = arith.divf %402, %403 : vector<8x128xf32>
    %405 = vector.extract_strided_slice %404 {offsets = [0, 0], sizes = [8, 64], strides = [1, 1]} : vector<8x128xf32> to vector<8x64xf32>
    %406 = vector.extract_strided_slice %404 {offsets = [0, 64], sizes = [8, 64], strides = [1, 1]} : vector<8x128xf32> to vector<8x64xf32>
    %407 = vector.extract_strided_slice %394 {offsets = [0, 128], sizes = [8, 64], strides = [1, 1]} : vector<8x192xf32> to vector<8x64xf32>
    %408 = vector.extract_strided_slice %396 {offsets = [0, 128], sizes = [8, 64], strides = [1, 1]} : vector<8x192xf32> to vector<8x64xf32>
    %409 = arith.mulf %405, %408 : vector<8x64xf32>
    %410 = arith.addf %407, %409 : vector<8x64xf32>
    %411 = math.tanh %410 : vector<8x64xf32>
    %cst_60 = arith.constant 1.000000e+00 : f32
    %412 = vector.broadcast %cst_60 : f32 to vector<8x64xf32>
    %413 = arith.subf %412, %406 : vector<8x64xf32>
    %414 = arith.mulf %413, %411 : vector<8x64xf32>
    %415 = arith.mulf %406, %391 : vector<8x64xf32>
    %416 = arith.addf %414, %415 : vector<8x64xf32>
    %417 = vector.extract_strided_slice %235 {offsets = [56, 0], sizes = [8, 192], strides = [1, 1]} : vector<64x192xf32> to vector<8x192xf32>
    %418 = vector.extract_strided_slice %236 {offsets = [0, 0], sizes = [8, 192], strides = [1, 1]} : vector<64x192xf32> to vector<8x192xf32>
    %419 = arith.addf %417, %418 : vector<8x192xf32>
    %cst_61 = arith.constant dense<0.000000e+00> : vector<8x192xf32>
    %420 = tpu.matmul %416, %237, %cst_61 {dimension_numbers = #tpu.dot_dimension_numbers<[1], [0], [0], [1], [0, 0, 1, 1], [], []>} : vector<8x64xf32>, vector<64x192xf32>, vector<8x192xf32> -> vector<8x192xf32>
    %421 = arith.addf %420, %240 : vector<8x192xf32>
    %422 = vector.extract_strided_slice %419 {offsets = [0, 0], sizes = [8, 128], strides = [1, 1]} : vector<8x192xf32> to vector<8x128xf32>
    %423 = vector.extract_strided_slice %421 {offsets = [0, 0], sizes = [8, 128], strides = [1, 1]} : vector<8x192xf32> to vector<8x128xf32>
    %424 = arith.addf %422, %423 : vector<8x128xf32>
    %425 = arith.negf %424 : vector<8x128xf32>
    %426 = math.exp %425 : vector<8x128xf32>
    %cst_62 = arith.constant 1.000000e+00 : f32
    %427 = vector.broadcast %cst_62 : f32 to vector<8x128xf32>
    %428 = arith.addf %427, %426 : vector<8x128xf32>
    %429 = arith.divf %427, %428 : vector<8x128xf32>
    %430 = vector.extract_strided_slice %429 {offsets = [0, 0], sizes = [8, 64], strides = [1, 1]} : vector<8x128xf32> to vector<8x64xf32>
    %431 = vector.extract_strided_slice %429 {offsets = [0, 64], sizes = [8, 64], strides = [1, 1]} : vector<8x128xf32> to vector<8x64xf32>
    %432 = vector.extract_strided_slice %419 {offsets = [0, 128], sizes = [8, 64], strides = [1, 1]} : vector<8x192xf32> to vector<8x64xf32>
    %433 = vector.extract_strided_slice %421 {offsets = [0, 128], sizes = [8, 64], strides = [1, 1]} : vector<8x192xf32> to vector<8x64xf32>
    %434 = arith.mulf %430, %433 : vector<8x64xf32>
    %435 = arith.addf %432, %434 : vector<8x64xf32>
    %436 = math.tanh %435 : vector<8x64xf32>
    %cst_63 = arith.constant 1.000000e+00 : f32
    %437 = vector.broadcast %cst_63 : f32 to vector<8x64xf32>
    %438 = arith.subf %437, %431 : vector<8x64xf32>
    %439 = arith.mulf %438, %436 : vector<8x64xf32>
    %440 = arith.mulf %431, %416 : vector<8x64xf32>
    %441 = arith.addf %439, %440 : vector<8x64xf32>
    %442 = vector.extract_strided_slice %441 {offsets = [0, 0], sizes = [8, 32], strides = [1, 1]} : vector<8x64xf32> to vector<8x32xf32>
    %443 = vector.extract_strided_slice %441 {offsets = [0, 32], sizes = [8, 32], strides = [1, 1]} : vector<8x64xf32> to vector<8x32xf32>
    %444 = arith.addf %442, %443 : vector<8x32xf32>
    %c200 = arith.constant 200 : index
    %c0_64 = arith.constant 0 : index
    %445 = vector.load %arg2[%c200, %c0_64] : memref<256x192xf32, #tpu.memory_space<vmem>>, vector<4x32xf32>
    %c208 = arith.constant 208 : index
    %c0_65 = arith.constant 0 : index
    %446 = vector.load %arg2[%c208, %c0_65] : memref<256x192xf32, #tpu.memory_space<vmem>>, vector<32x25xf32>
    %c240 = arith.constant 240 : index
    %c0_66 = arith.constant 0 : index
    %447 = vector.load %arg2[%c240, %c0_66] : memref<256x192xf32, #tpu.memory_space<vmem>>, vector<4x4xf32>
    %c248 = arith.constant 248 : index
    %c0_67 = arith.constant 0 : index
    %448 = vector.load %arg2[%c248, %c0_67] : memref<256x192xf32, #tpu.memory_space<vmem>>, vector<1x25xf32>
    %cst_68 = arith.constant 0.176776692 : f32
    %449 = vector.broadcast %cst_68 : f32 to vector<4x32xf32>
    %450 = arith.mulf %445, %449 : vector<4x32xf32>
    %cst_69 = arith.constant dense<0.000000e+00> : vector<4x25xf32>
    %451 = tpu.matmul %450, %446, %cst_69 {dimension_numbers = #tpu.dot_dimension_numbers<[1], [0], [0], [1], [0, 0, 1, 1], [], []>} : vector<4x32xf32>, vector<32x25xf32>, vector<4x25xf32> -> vector<4x25xf32>
    %cst_70 = arith.constant dense<0.000000e+00> : vector<4x25xf32>
    %452 = tpu.matmul %447, %451, %cst_70 {dimension_numbers = #tpu.dot_dimension_numbers<[1], [0], [0], [1], [0, 0, 1, 1], [], []>} : vector<4x4xf32>, vector<4x25xf32>, vector<4x25xf32> -> vector<4x25xf32>
    %453 = vector.broadcast %448 : vector<1x25xf32> to vector<4x25xf32>
    %454 = arith.addf %452, %453 : vector<4x25xf32>
    %cst_71 = arith.constant 0.000000e+00 : f32
    %455 = vector.broadcast %cst_71 : f32 to vector<4x25xf32>
    %456 = arith.cmpf oge, %454, %455 : vector<4x25xf32>
    %cst_72 = arith.constant 0.00999999977 : f32
    %457 = vector.broadcast %cst_72 : f32 to vector<4x25xf32>
    %458 = arith.mulf %457, %454 : vector<4x25xf32>
    %459 = arith.select %456, %454, %458 : vector<4x25xi1>, vector<4x25xf32>
    %cst_73 = arith.constant dense<0xFF800000> : vector<4xf32>
    %460 = vector.multi_reduction <maximumf>, %459, %cst_73 [1] : vector<4x25xf32> to vector<4xf32>
    %461 = vector.shape_cast %460 : vector<4xf32> to vector<4x1xf32>
    %cst_74 = arith.constant dense<0xFF800000> : vector<1xf32>
    %462 = vector.multi_reduction <maximumf>, %461, %cst_74 [0] : vector<4x1xf32> to vector<1xf32>
    %463 = vector.shape_cast %462 : vector<1xf32> to vector<1x1xf32>
    %464 = vector.broadcast %463 : vector<1x1xf32> to vector<4x1xf32>
    %465 = arith.subf %461, %464 : vector<4x1xf32>
    %466 = math.exp %465 : vector<4x1xf32>
    %cst_75 = arith.constant dense<0.000000e+00> : vector<1xf32>
    %467 = vector.multi_reduction <add>, %466, %cst_75 [0] : vector<4x1xf32> to vector<1xf32>
    %468 = vector.shape_cast %467 : vector<1xf32> to vector<1x1xf32>
    %469 = vector.broadcast %468 : vector<1x1xf32> to vector<4x1xf32>
    %470 = arith.divf %466, %469 : vector<4x1xf32>
    %471 = tpu.concatenate %470, %470 in 0 : vector<4x1xf32>, vector<4x1xf32> -> vector<8x1xf32>
    %472 = vector.broadcast %471 : vector<8x1xf32> to vector<8x32xf32>
    %473 = arith.mulf %444, %472 : vector<8x32xf32>
    %474 = arith.addf %473, %444 : vector<8x32xf32>
    %cst_76 = arith.constant dense<0.000000e+00> : vector<8xf32>
    %475 = vector.multi_reduction <add>, %474, %cst_76 [1] : vector<8x32xf32> to vector<8xf32>
    %476 = vector.shape_cast %475 : vector<8xf32> to vector<8x1xf32>
    %cst_77 = arith.constant 3.200000e+01 : f32
    %477 = vector.broadcast %cst_77 : f32 to vector<8x1xf32>
    %478 = arith.divf %476, %477 : vector<8x1xf32>
    %479 = vector.broadcast %478 : vector<8x1xf32> to vector<8x32xf32>
    %480 = arith.subf %474, %479 : vector<8x32xf32>
    %481 = arith.mulf %480, %480 : vector<8x32xf32>
    %cst_78 = arith.constant dense<0.000000e+00> : vector<8xf32>
    %482 = vector.multi_reduction <add>, %481, %cst_78 [1] : vector<8x32xf32> to vector<8xf32>
    %483 = vector.shape_cast %482 : vector<8xf32> to vector<8x1xf32>
    %cst_79 = arith.constant 3.200000e+01 : f32
    %484 = vector.broadcast %cst_79 : f32 to vector<8x1xf32>
    %485 = arith.divf %483, %484 : vector<8x1xf32>
    %c6 = arith.constant 6 : index
    %c0_80 = arith.constant 0 : index
    %486 = vector.load %arg2[%c6, %c0_80] : memref<256x192xf32, #tpu.memory_space<vmem>>, vector<1x32xf32>
    %c7 = arith.constant 7 : index
    %c0_81 = arith.constant 0 : index
    %487 = vector.load %arg2[%c7, %c0_81] : memref<256x192xf32, #tpu.memory_space<vmem>>, vector<1x32xf32>
    %488 = vector.broadcast %478 : vector<8x1xf32> to vector<8x32xf32>
    %489 = arith.subf %474, %488 : vector<8x32xf32>
    %cst_82 = arith.constant 9.99999974E-6 : f32
    %490 = vector.broadcast %cst_82 : f32 to vector<8x1xf32>
    %491 = arith.addf %485, %490 : vector<8x1xf32>
    %492 = math.rsqrt %491 : vector<8x1xf32>
    %493 = vector.broadcast %492 : vector<8x1xf32> to vector<8x32xf32>
    %494 = arith.mulf %489, %493 : vector<8x32xf32>
    %495 = vector.broadcast %486 : vector<1x32xf32> to vector<8x32xf32>
    %496 = arith.mulf %494, %495 : vector<8x32xf32>
    %497 = vector.broadcast %487 : vector<1x32xf32> to vector<8x32xf32>
    %498 = arith.addf %496, %497 : vector<8x32xf32>
    %499 = vector.extract_strided_slice %498 {offsets = [0, 0], sizes = [4, 32], strides = [1, 1]} : vector<8x32xf32> to vector<4x32xf32>
    %cst_83 = arith.constant dense<0.000000e+00> : vector<32xf32>
    %500 = vector.multi_reduction <add>, %499, %cst_83 [0] : vector<4x32xf32> to vector<32xf32>
    %501 = vector.shape_cast %500 : vector<32xf32> to vector<1x32xf32>
    %502 = vector.extract_strided_slice %498 {offsets = [4, 0], sizes = [4, 32], strides = [1, 1]} : vector<8x32xf32> to vector<4x32xf32>
    %cst_84 = arith.constant dense<0.000000e+00> : vector<32xf32>
    %503 = vector.multi_reduction <add>, %502, %cst_84 [0] : vector<4x32xf32> to vector<32xf32>
    %504 = vector.shape_cast %503 : vector<32xf32> to vector<1x32xf32>
    %505 = tpu.concatenate %501, %504 in 0 : vector<1x32xf32>, vector<1x32xf32> -> vector<2x32xf32>
    %cst_85 = arith.constant 0.000000e+00 : f32
    %506 = vector.broadcast %cst_85 : f32 to vector<2x96xf32>
    %507 = tpu.concatenate %505, %506 in 1 : vector<2x32xf32>, vector<2x96xf32> -> vector<2x128xf32>
    %cst_86 = arith.constant 0.000000e+00 : f32
    %508 = vector.broadcast %cst_86 : f32 to vector<4x127xf32>
    %509 = tpu.concatenate %470, %508 in 1 : vector<4x1xf32>, vector<4x127xf32> -> vector<4x128xf32>
    %cst_87 = arith.constant 0.000000e+00 : f32
    %510 = vector.broadcast %cst_87 : f32 to vector<4x103xf32>
    %511 = tpu.concatenate %451, %510 in 1 : vector<4x25xf32>, vector<4x103xf32> -> vector<4x128xf32>
    %cst_88 = arith.constant 0.000000e+00 : f32
    %512 = vector.broadcast %cst_88 : f32 to vector<4x103xf32>
    %513 = tpu.concatenate %459, %512 in 1 : vector<4x25xf32>, vector<4x103xf32> -> vector<4x128xf32>
    %cst_89 = arith.constant 0.000000e+00 : f32
    %514 = vector.broadcast %cst_89 : f32 to vector<2x128xf32>
    %515 = tpu.concatenate %507, %509, %511, %513, %514 in 0 : vector<2x128xf32>, vector<4x128xf32>, vector<4x128xf32>, vector<4x128xf32>, vector<2x128xf32> -> vector<16x128xf32>
    %c0_90 = arith.constant 0 : index
    %c0_91 = arith.constant 0 : index
    %c0_92 = arith.constant 0 : index
    %516 = vector.load %arg3[%c0_90, %c0_91, %c0_92] : memref<1x16x128xf32, #tpu.memory_space<vmem>>, vector<1x16x128xf32>
    %517 = vector.shape_cast %516 : vector<1x16x128xf32> to vector<16x128xf32>
    %518 = vector.shape_cast %515 : vector<16x128xf32> to vector<1x16x128xf32>
    tpu.vector_store %arg3[%c0_90, %c0_91, %c0_92], %518 {strides = array<i32>} : memref<1x16x128xf32, #tpu.memory_space<vmem>>, vector<1x16x128xf32>,
    return
  }
  func.func @transform_0(%arg0: i32) -> (i32, i32, i32) {
    %c0_i32 = arith.constant 0 : i32
    %c0_i32_0 = arith.constant 0 : i32
    %c0_i32_1 = arith.constant 0 : i32
    return %arg0, %c0_i32, %c0_i32_0 : i32, i32, i32
  }
  func.func @transform_1(%arg0: i32) -> (i32, i32) {
    %c0_i32 = arith.constant 0 : i32
    %c0_i32_0 = arith.constant 0 : i32
    %c0_i32_1 = arith.constant 0 : i32
    return %c0_i32, %c0_i32_0 : i32, i32
  }
  func.func @transform_2(%arg0: i32) -> (i32, i32, i32) {
    %c0_i32 = arith.constant 0 : i32
    %c0_i32_0 = arith.constant 0 : i32
    %c0_i32_1 = arith.constant 0 : i32
    return %arg0, %c0_i32, %c0_i32_0 : i32, i32, i32
  }
}

</mosaic_0001>

<bundles_post_ra>
// kernel: tpu_custom_call.1
= control target key start
LH: loop header
LB: loop body
LE: loop exit
PB: predicated region body
PF: predicated region fallthrough
CT: control target
= control target key end

     0   :  { %v2920_v7 = vmov 0.0   ;;  %v2921_v8 = vmov 0   ;;  %s3678_s0 = inlined_call_operand.vmem [shape: f32[1,64,2], index: 0, kind: input, shape index: {}]   ;;  %s3679_s1 = inlined_call_operand.vmem [shape: f32[256,192], index: 1, kind: input, shape index: {}]   ;;  %s3680_s2 = inlined_call_operand.hbm [shape: f32[1,16,128], index: 2, kind: output, shape index: {}]  }
   0x1   :  { %v195_v0 = vld [vmem:[%s3679_s1 + $0x18] sm:$0xff]  ;;  %v197_v1 = vld [vmem:[%s3679_s1 + $0x28] sm:$0xff]  ;;  %v194_v2 = vld [vmem:[%s3679_s1 + $0x10] sm:$0xff]  ;;  %291 = vmatprep.mubr.f32.mxu0 %v2920_v7  ;;  %2790 = vset.pattern.permute.xlu0 %v2921_v8 }
   0x2   :  { %v2954_v3 = vpack.c.bf16 %v197_v1, %v195_v0  ;;  %v196_v4 = vld [vmem:[%s3679_s1 + $0x20] sm:$0xff]  ;;  %v199_v5 = vld [vmem:[%s3679_s1 + $0x38] sm:$0xff]  ;;  %v201_v6 = vld [vmem:[%s3679_s1 + $0x48] sm:$0xff]  ;;  %2792 = vset.pattern.permute.xlu1 %v2921_v8  ;;  %385 = vmatprep.mubr.f32.mxu1 %v2920_v7 }
   0x3   :  { %v2967_v9 = vpack.c.bf16 %v196_v4, %v194_v2  ;;  %v2969_v10 = vpack.c.bf16 %v201_v6, %v199_v5  ;;  %v198_v11 = vld [vmem:[%s3679_s1 + $0x30] sm:$0xff]  ;;  %v200_v12 = vld [vmem:[%s3679_s1 + $0x40] sm:$0xff]  ;;  %v203_v13 = vld [vmem:[%s3679_s1 + $0x58] sm:$0xff] }
   0x4   :  { %2471 = vmatprep.subr.bf16.mxu0 %v2954_v3  ;;  %v205_v14 = vld [vmem:[%s3679_s1 + $0x68] sm:$0xff]  ;;  %2487 = vmatprep.subr.bf16.mxu1 %v2954_v3  ;;  %v2988_v15 = vpack.c.bf16 %v200_v12, %v198_v11  ;;  %v202_v17 = vld [vmem:[%s3679_s1 + $0x50] sm:$0xff]  ;;  %v204_v18 = vld [vmem:[%s3679_s1 + $0x60] sm:$0xff] }
   0x5   :  { %2473 = vmatpush1.bf16.msra.mxu0 %v2967_v9  ;;  %2489 = vmatpush1.bf16.msra.mxu1 %v2967_v9  ;;  %v2992_v16 = vpack.c.bf16 %v205_v14, %v203_v13  ;;  %v12_v19 = vld [vmem:[%s3678_s0] sm:$0xff]  ;;  %v207_v20 = vld [vmem:[%s3679_s1 + $0x78] sm:$0xff]  ;;  %v209_v21 = vld [vmem:[%s3679_s1 + $0x88] sm:$0xff] }
   0x6   :  { %2475 = vmatprep.subr.bf16.mxu0 %v2969_v10  ;;  %2491 = vmatprep.subr.bf16.mxu1 %v2969_v10 }
   0x7   :  { %27 = vperm.xlu0 %2790, %v12_v19  }
   0x8   :  { %7 = vsyncpa [#allocation3], 0  ;;  %v3011_v22 = vpack.c.bf16 %v204_v18, %v202_v17  ;;  %v3015_v23 = vpack.c.bf16 %v209_v21, %v207_v20  ;;  %v206_v24 = vld [vmem:[%s3679_s1 + $0x70] sm:$0xff]  ;;  %v208_v25 = vld [vmem:[%s3679_s1 + $0x80] sm:$0xff]  ;;  %v2922_v26 = vmov 1   ;;  %v66_v29 = vlaneseq  ;;  %s2923_s25 = smov 64  }
   0x9   :  { %2477 = vmatpush1.bf16.msra.mxu0 %v2988_v15  ;;  %2493 = vmatpush1.bf16.msra.mxu1 %v2988_v15  ;;  %v3025_v27 = vpack.c.bf16 %v208_v25, %v206_v24  ;;  %v3030_v28 = vld [vmem:[%s3678_s0 + $0x8] sm:$0xff]  ;;  %vm223_vm0 = vcmask 523264   ;;  %vm1060_vm1 = vcmask 261120   ;;  %vm2926_vm2 = vmmov 0  }
   0xa   :  { %2479 = vmatprep.subr.bf16.mxu0 %v2992_v16  ;;  %2495 = vmatprep.subr.bf16.mxu1 %v2992_v16  ;;  %v67_v30 = vshrl.u32 %v66_v29, 7  ;;  %v20_v33 = vld [vmem:[%s3679_s1] ss:$8 sm:$0x3]  ;;  %vm2185_vm3 = vcmask 1043456   ;;  %vm2181_vm4 = vcmask 31744  }
   0xb   :  { %2791 = vset.pattern.permute.xlu0 %v2922_v26  ;;  %v2393_v34 = vld [vmem:[%s3679_s1 + $0x1] ss:$8 sm:$0x3]  ;;  %v2394_v40 = vld [vmem:[%s3679_s1 + $0x2] ss:$8 sm:$0x3] }
   0xc   :  { %93 = vperm.xlu0 %2791, %v12_v19   ;;  %v3050_v32 = vsub.s32 0, %v67_v30  ;;  %v2395_v41 = vld [vmem:[%s3679_s1 + $0x3] ss:$8 sm:$0x3]  ;;  %v3080_v51 = vsub.s32 1, %v67_v30  ;;  %vm2357_vm5 = vcmask 203776  }
   0xd   :  { %2481 = vmatpush1.bf16.msra.mxu0 %v3011_v22  ;;  %2497 = vmatpush1.bf16.msra.mxu1 %v3011_v22  ;;  %vm2262_vm7 = vcmask 199680   ;;  %vm2369_vm8 = vcmask 1041408   ;;  %vm2371_vm9 = vcmask 1045504   ;;  %vm2330_vm10 = vcmask 781824  }
   0xe   :  { %2483 = vmatprep.subr.bf16.mxu0 %v3015_v23  ;;  %2499 = vmatprep.subr.bf16.mxu1 %v3015_v23  ;;  %v3059_v35 = vrot.slane %v20_v33, %v3050_v32  ;;  %v3062_v36 = vrot.slane %v2393_v34, %v3050_v32  ;;  %v3073_v43 = vrot.slane %v2394_v40, %v3050_v32  ;;  %vm2348_vm11 = vcmask 1040384  }
   0xf   :  { %v3076_v44 = vrot.slane %v2395_v41, %v3050_v32  ;;  %v3083_v54 = vrot.slane %v20_v33, %v3080_v51  ;;  %v3086_v55 = vrot.slane %v2393_v34, %v3080_v51  ;;  %v3091_v58 = vrot.slane %v2395_v41, %v3080_v51 }
  0x10   :  { %97 = vperm.xlu0 %2791, %v3030_v28   ;;  %v3094_v59 = vrot.slane %v2394_v40, %v3080_v51  ;;  %vm2355_vm12 = vcmask 7168  }
  0x11   :  { %2485 = vmatpush1.bf16.msra.mxu0 %v3025_v27  ;;  %2501 = vmatpush1.bf16.msra.mxu1 %v3025_v27 }
  0x12   :  { %2503 = vmatprep.subr.bf16.mxu0 %v2954_v3  ;;  %2519 = vmatprep.subr.bf16.mxu1 %v2954_v3 }
  0x14   :  { %292 = vmatmul.mubr.f32.vlgmr.msra.gmra.mrb[0].mxu0 %v2920_v7 }
  0x15   :  { %2505 = vmatpush1.bf16.msra.mxu0 %v2967_v9  ;;  %479 = vmatprep.mubr.f32.mxu0 %v2920_v7 }
  0x16   :  { %2507 = vmatprep.subr.bf16.mxu0 %v2969_v10 }
  0x19   :  { %2509 = vmatpush1.bf16.msra.mxu0 %v2988_v15 }
  0x1a   :  { %2511 = vmatprep.subr.bf16.mxu0 %v2992_v16 }
  0x1d   :  { %2513 = vmatpush1.bf16.msra.mxu0 %v3011_v22 }
  0x1e   :  { %2515 = vmatprep.subr.bf16.mxu0 %v3015_v23 }
  0x21   :  { %2517 = vmatpush1.bf16.msra.mxu0 %v3025_v27 }
  0x22   :  { %2535 = vmatprep.subr.bf16.mxu0 %v2954_v3 }
  0x86   :  { %v28_v31 = vpop.permute.xlu0 %27 }
  0x87   :  { %v76_v38 = vmul.f32 %v3059_v35, %v28_v31  ;;  %v77_v56 = vmul.f32 %v3083_v54, %v28_v31 }
  0x8b   :  { %v94_v37 = vpop.permute.xlu0 %93 }
  0x8c   :  { %v135_v39 = vmul.f32 %v3062_v36, %v94_v37  ;;  %v136_v57 = vmul.f32 %v3086_v55, %v94_v37 }
  0x8e   :  { %v151_v42 = vadd.f32 %v135_v39, %v76_v38  ;;  %v152_v60 = vadd.f32 %v136_v57, %v77_v56 }
  0x8f   :  { %v98_v17 = vpop.permute.xlu0 %97 }
  0x90   :  { %v178_v46 = vadd.f32 %v3073_v43, %v151_v42  ;;  %v179_v63 = vadd.f32 %v3094_v59, %v152_v60  ;;  %v137_v19 = vmul.f32 %v3062_v36, %v98_v17  ;;  %v138_v34 = vmul.f32 %v3086_v55, %v98_v17 }
  0xe7   :  { %v293_v45 = vpop.f32.mrb[0].mxu0 }
  0xe8   :  { %v294_v47 = vadd.f32 %v293_v45, %v3076_v44  ;;  %v295_v48 = vpop.f32.mrb[1].mxu0 }
  0xe9   :  { %v296_v61 = vadd.f32 %v295_v48, %v3091_v58 }
  0xea   :  { %v298_v49 = vadd.f32 %v294_v47, %v178_v46  ;;  %v14_v46 = vld [vmem:[%s3678_s0 + $0x10] sm:$0xff] }
  0xec   :  { %v2396_v50 = vmul.f32 -1.442695, %v298_v49 }
  0xee   :  { %2794 = vpow2.f32 %v2396_v50 }
  0xf8   :  { %v2795_v52 = vpop.eup %2794 }
  0xf9   :  { %v302_v53 = vadd.f32 1.0, %v2795_v52 }
  0xfb   :  { %2796 = vrcp.f32 %v302_v53 }
 0x105   :  { %v2797_v62 = vpop.eup %2796 }
 0x106   :  { %v305_v0 = vmul.f32 %v2797_v62, %v296_v61  ;;  %v308_v4 = vsub.f32 1.0, %v2797_v62  ;;  %v314_v6 = vmul.f32 0.0, %v2797_v62 }
 0x108   :  { %v306_v1 = vadd.f32 %v305_v0, %v179_v63 }
 0x10a   :  { %2798 = vtanh.f32 %v306_v1 }
 0x114   :  { %v2799_v2 = vpop.eup %2798 }
 0x115   :  { %310 = vrot.lane.b32.xlu1 %v2799_v2, %s2923_s25 }
 0x187   :  { %v311_v5 = vpop.permute.xlu1 %310 }
 0x188   :  { %v313_v11 = vmul.f32 %v311_v5, %v308_v4 }
 0x18a   :  { %v3099_v12 = vadd.f32 %v314_v6, %v313_v11 }
 0x18c   :  { %317 = vrot.lane.b32.xlu1 %v3099_v12, %s2923_s25 }
 0x190   :  { %32 = vperm.xlu1 %2792, %v3030_v28  }
 0x1fe   :  { %v318_v13 = vpop.permute.xlu1 %317 }
 0x1ff   :  { %2397 = vmatmul.mubr.msk.f32.vlgmr.msra.gmra.mrb[0].mxu1 %vm223_vm0, %v318_v13 }
 0x200   :  { %2521 = vmatpush1.bf16.msra.mxu1 %v2967_v9  ;;  %573 = vmatprep.mubr.f32.mxu1 %v2920_v7 }
 0x201   :  { %2523 = vmatprep.subr.bf16.mxu1 %v2969_v10 }
 0x204   :  { %2525 = vmatpush1.bf16.msra.mxu1 %v2988_v15 }
 0x205   :  { %2527 = vmatprep.subr.bf16.mxu1 %v2992_v16 }
 0x208   :  { %2529 = vmatpush1.bf16.msra.mxu1 %v3011_v22 }
 0x209   :  { %2531 = vmatprep.subr.bf16.mxu1 %v3015_v23 }
 0x20c   :  { %2533 = vmatpush1.bf16.msra.mxu1 %v3025_v27 }
 0x20d   :  { %2551 = vmatprep.subr.bf16.mxu1 %v2954_v3 }
 0x20f   :  { %v33_v14 = vpop.permute.xlu1 %32 }
 0x210   :  { %v78_v18 = vmul.f32 %v3059_v35, %v33_v14  ;;  %v79_v33 = vmul.f32 %v3083_v54, %v33_v14 }
 0x212   :  { %v153_v20 = vadd.f32 %v137_v19, %v78_v18  ;;  %v154_v37 = vadd.f32 %v138_v34, %v79_v33 }
 0x214   :  { %v180_v24 = vadd.f32 %v3073_v43, %v153_v20  ;;  %v181_v40 = vadd.f32 %v3094_v59, %v154_v37 }
 0x2d2   :  { %v387_v21 = vpop.f32.mrb[0].mxu1 }
 0x2d3   :  { %v388_v25 = vadd.f32 %v387_v21, %v3076_v44  ;;  %v389_v26 = vpop.f32.mrb[1].mxu1 }
 0x2d4   :  { %v390_v38 = vadd.f32 %v389_v26, %v3091_v58  ;;  %v15_v26 = vld [vmem:[%s3678_s0 + $0x18] sm:$0xff] }
 0x2d5   :  { %v392_v28 = vadd.f32 %v388_v25, %v180_v24 }
 0x2d7   :  { %v2398_v29 = vmul.f32 -1.442695, %v392_v28 }
 0x2d9   :  { %2800 = vpow2.f32 %v2398_v29 }
 0x2e3   :  { %v2801_v30 = vpop.eup %2800 }
 0x2e4   :  { %v396_v31 = vadd.f32 1.0, %v2801_v30 }
 0x2e6   :  { %2802 = vrcp.f32 %v396_v31 }
 0x2f0   :  { %v2803_v39 = vpop.eup %2802 }
 0x2f1   :  { %v399_v41 = vmul.f32 %v2803_v39, %v390_v38  ;;  %v402_v47 = vsub.f32 1.0, %v2803_v39  ;;  %v408_v49 = vmul.f32 %v2803_v39, %v3099_v12 }
 0x2f3   :  { %v400_v42 = vadd.f32 %v399_v41, %v181_v40 }
 0x2f5   :  { %2804 = vtanh.f32 %v400_v42 }
 0x2ff   :  { %v2805_v45 = vpop.eup %2804 }
 0x300   :  { %404 = vrot.lane.b32.xlu1 %v2805_v45, %s2923_s25 }
 0x304   :  { %37 = vperm.xlu1 %2792, %v14_v46  }
 0x372   :  { %v405_v48 = vpop.permute.xlu1 %404 }
 0x373   :  { %v407_v50 = vmul.f32 %v405_v48, %v402_v47 }
 0x375   :  { %v3127_v52 = vadd.f32 %v408_v49, %v407_v50 }
 0x377   :  { %411 = vrot.lane.b32.xlu0 %v3127_v52, %s2923_s25 }
 0x37b   :  { %101 = vperm.xlu0 %2791, %v14_v46  }
 0x383   :  { %v38_v57 = vpop.permute.xlu1 %37 }
 0x384   :  { %v80_v61 = vmul.f32 %v3059_v35, %v38_v57  ;;  %v81_v14 = vmul.f32 %v3083_v54, %v38_v57 }
 0x3e9   :  { %v412_v53 = vpop.permute.xlu0 %411 }
 0x3ea   :  { %2399 = vmatmul.mubr.msk.f32.vlgmr.msra.gmra.mrb[2].mxu0 %vm223_vm0, %v412_v53 }
 0x3eb   :  { %2537 = vmatpush1.bf16.msra.mxu0 %v2967_v9  ;;  %667 = vmatprep.mubr.f32.mxu0 %v2920_v7 }
 0x3ec   :  { %2539 = vmatprep.subr.bf16.mxu0 %v2969_v10 }
 0x3ef   :  { %2541 = vmatpush1.bf16.msra.mxu0 %v2988_v15 }
 0x3f0   :  { %2543 = vmatprep.subr.bf16.mxu0 %v2992_v16 }
 0x3f3   :  { %2545 = vmatpush1.bf16.msra.mxu0 %v3011_v22 }
 0x3f4   :  { %2547 = vmatprep.subr.bf16.mxu0 %v3015_v23 }
 0x3f7   :  { %2549 = vmatpush1.bf16.msra.mxu0 %v3025_v27 }
 0x3f8   :  { %2567 = vmatprep.subr.bf16.mxu0 %v2954_v3 }
 0x3fa   :  { %v102_v56 = vpop.permute.xlu0 %101 }
 0x3fb   :  { %v139_v60 = vmul.f32 %v3062_v36, %v102_v56  ;;  %v140_v13 = vmul.f32 %v3086_v55, %v102_v56 }
 0x3fd   :  { %v155_v62 = vadd.f32 %v139_v60, %v80_v61  ;;  %v156_v17 = vadd.f32 %v140_v13, %v81_v14 }
 0x3ff   :  { %v182_v0 = vadd.f32 %v3073_v43, %v155_v62  ;;  %v183_v20 = vadd.f32 %v3094_v59, %v156_v17 }
 0x4bd   :  { %v481_v63 = vpop.f32.mrb[2].mxu0 }
 0x4be   :  { %v482_v1 = vadd.f32 %v481_v63, %v3076_v44  ;;  %v483_v2 = vpop.f32.mrb[3].mxu0 }
 0x4bf   :  { %v484_v18 = vadd.f32 %v483_v2, %v3091_v58  ;;  %v16_v2 = vld [vmem:[%s3678_s0 + $0x20] sm:$0xff] }
 0x4c0   :  { %v486_v4 = vadd.f32 %v482_v1, %v182_v0 }
 0x4c2   :  { %v2400_v5 = vmul.f32 -1.442695, %v486_v4 }
 0x4c4   :  { %2806 = vpow2.f32 %v2400_v5 }
 0x4ce   :  { %v2807_v6 = vpop.eup %2806 }
 0x4cf   :  { %v490_v11 = vadd.f32 1.0, %v2807_v6 }
 0x4d1   :  { %2808 = vrcp.f32 %v490_v11 }
 0x4db   :  { %v2809_v19 = vpop.eup %2808 }
 0x4dc   :  { %v493_v21 = vmul.f32 %v2809_v19, %v484_v18  ;;  %v496_v28 = vsub.f32 1.0, %v2809_v19  ;;  %v502_v30 = vmul.f32 %v2809_v19, %v3127_v52 }
 0x4de   :  { %v494_v24 = vadd.f32 %v493_v21, %v183_v20 }
 0x4e0   :  { %2810 = vtanh.f32 %v494_v24 }
 0x4ea   :  { %v2811_v25 = vpop.eup %2810 }
 0x4eb   :  { %498 = vrot.lane.b32.xlu1 %v2811_v25, %s2923_s25 }
 0x4ef   :  { %42 = vperm.xlu1 %2792, %v15_v26  }
 0x55d   :  { %v499_v29 = vpop.permute.xlu1 %498 }
 0x55e   :  { %v501_v31 = vmul.f32 %v499_v29, %v496_v28 }
 0x560   :  { %v3154_v33 = vadd.f32 %v502_v30, %v501_v31 }
 0x562   :  { %505 = vrot.lane.b32.xlu0 %v3154_v33, %s2923_s25 }
 0x566   :  { %105 = vperm.xlu0 %2791, %v15_v26  }
 0x56e   :  { %v43_v38 = vpop.permute.xlu1 %42 }
 0x56f   :  { %v82_v40 = vmul.f32 %v3059_v35, %v43_v38  ;;  %v83_v56 = vmul.f32 %v3083_v54, %v43_v38 }
 0x5d4   :  { %v506_v34 = vpop.permute.xlu0 %505 }
 0x5d5   :  { %2401 = vmatmul.mubr.msk.f32.vlgmr.msra.gmra.mrb[2].mxu1 %vm223_vm0, %v506_v34 }
 0x5d6   :  { %2553 = vmatpush1.bf16.msra.mxu1 %v2967_v9  ;;  %761 = vmatprep.mubr.f32.mxu1 %v2920_v7 }
 0x5d7   :  { %2555 = vmatprep.subr.bf16.mxu1 %v2969_v10 }
 0x5da   :  { %2557 = vmatpush1.bf16.msra.mxu1 %v2988_v15 }
 0x5db   :  { %2559 = vmatprep.subr.bf16.mxu1 %v2992_v16 }
 0x5de   :  { %2561 = vmatpush1.bf16.msra.mxu1 %v3011_v22 }
 0x5df   :  { %2563 = vmatprep.subr.bf16.mxu1 %v3015_v23 }
 0x5e2   :  { %2565 = vmatpush1.bf16.msra.mxu1 %v3025_v27 }
 0x5e3   :  { %2583 = vmatprep.subr.bf16.mxu1 %v2954_v3 }
 0x5e5   :  { %v106_v37 = vpop.permute.xlu0 %105 }
 0x5e6   :  { %v141_v39 = vmul.f32 %v3062_v36, %v106_v37  ;;  %v142_v3 = vmul.f32 %v3086_v55, %v106_v37 }
 0x5e8   :  { %v157_v41 = vadd.f32 %v141_v39, %v82_v40  ;;  %v158_v57 = vadd.f32 %v142_v3, %v83_v56 }
 0x5ea   :  { %v184_v45 = vadd.f32 %v3073_v43, %v157_v41  ;;  %v185_v62 = vadd.f32 %v3094_v59, %v158_v57 }
 0x6a8   :  { %v575_v42 = vpop.f32.mrb[2].mxu1 }
 0x6a9   :  { %v576_v46 = vadd.f32 %v575_v42, %v3076_v44  ;;  %v577_v47 = vpop.f32.mrb[3].mxu1 }
 0x6aa   :  { %v578_v60 = vadd.f32 %v577_v47, %v3091_v58 }
 0x6ab   :  { %v580_v48 = vadd.f32 %v576_v46, %v184_v45 }
 0x6ad   :  { %v2402_v49 = vmul.f32 -1.442695, %v580_v48  ;;  %v17_v48 = vld [vmem:[%s3678_s0 + $0x28] sm:$0xff] }
 0x6af   :  { %2812 = vpow2.f32 %v2402_v49 }
 0x6b9   :  { %v2813_v50 = vpop.eup %2812 }
 0x6ba   :  { %v584_v53 = vadd.f32 1.0, %v2813_v50 }
 0x6bc   :  { %2814 = vrcp.f32 %v584_v53 }
 0x6c6   :  { %v2815_v61 = vpop.eup %2814 }
 0x6c7   :  { %v587_v63 = vmul.f32 %v2815_v61, %v578_v60  ;;  %v590_v4 = vsub.f32 1.0, %v2815_v61  ;;  %v596_v6 = vmul.f32 %v2815_v61, %v3154_v33 }
 0x6c9   :  { %v588_v0 = vadd.f32 %v587_v63, %v185_v62 }
 0x6cb   :  { %2816 = vtanh.f32 %v588_v0 }
 0x6d5   :  { %v2817_v1 = vpop.eup %2816 }
 0x6d6   :  { %592 = vrot.lane.b32.xlu1 %v2817_v1, %s2923_s25 }
 0x6da   :  { %47 = vperm.xlu1 %2792, %v16_v2  }
 0x748   :  { %v593_v5 = vpop.permute.xlu1 %592 }
 0x749   :  { %v595_v11 = vmul.f32 %v593_v5, %v590_v4 }
 0x74b   :  { %v3181_v13 = vadd.f32 %v596_v6, %v595_v11 }
 0x74d   :  { %599 = vrot.lane.b32.xlu0 %v3181_v13, %s2923_s25 }
 0x751   :  { %109 = vperm.xlu0 %2791, %v16_v2  }
 0x759   :  { %v48_v18 = vpop.permute.xlu1 %47 }
 0x75a   :  { %v84_v20 = vmul.f32 %v3059_v35, %v48_v18  ;;  %v85_v38 = vmul.f32 %v3083_v54, %v48_v18 }
 0x7bf   :  { %v600_v14 = vpop.permute.xlu0 %599 }
 0x7c0   :  { %2403 = vmatmul.mubr.msk.f32.vlgmr.msra.gmra.mrb[4].mxu0 %vm223_vm0, %v600_v14 }
 0x7c1   :  { %2569 = vmatpush1.bf16.msra.mxu0 %v2967_v9  ;;  %855 = vmatprep.mubr.f32.mxu0 %v2920_v7 }
 0x7c2   :  { %2571 = vmatprep.subr.bf16.mxu0 %v2969_v10 }
 0x7c5   :  { %2573 = vmatpush1.bf16.msra.mxu0 %v2988_v15 }
 0x7c6   :  { %2575 = vmatprep.subr.bf16.mxu0 %v2992_v16 }
 0x7c9   :  { %2577 = vmatpush1.bf16.msra.mxu0 %v3011_v22 }
 0x7ca   :  { %2579 = vmatprep.subr.bf16.mxu0 %v3015_v23 }
 0x7cd   :  { %2581 = vmatpush1.bf16.msra.mxu0 %v3025_v27 }
 0x7d0   :  { %v110_v17 = vpop.permute.xlu0 %109 }
 0x7d1   :  { %v143_v19 = vmul.f32 %v3062_v36, %v110_v17  ;;  %v144_v37 = vmul.f32 %v3086_v55, %v110_v17 }
 0x7d3   :  { %v159_v21 = vadd.f32 %v143_v19, %v84_v20  ;;  %v160_v39 = vadd.f32 %v144_v37, %v85_v38  ;;  %v18_v20 = vld [vmem:[%s3678_s0 + $0x30] sm:$0xff] }
 0x7d5   :  { %v186_v25 = vadd.f32 %v3073_v43, %v159_v21  ;;  %v187_v42 = vadd.f32 %v3094_v59, %v160_v39 }
 0x893   :  { %v669_v24 = vpop.f32.mrb[4].mxu0 }
 0x894   :  { %v670_v26 = vadd.f32 %v669_v24, %v3076_v44  ;;  %v671_v28 = vpop.f32.mrb[5].mxu0 }
 0x895   :  { %v672_v40 = vadd.f32 %v671_v28, %v3091_v58 }
 0x896   :  { %v674_v29 = vadd.f32 %v670_v26, %v186_v25 }
 0x898   :  { %v2404_v30 = vmul.f32 -1.442695, %v674_v29 }
 0x89a   :  { %2818 = vpow2.f32 %v2404_v30 }
 0x8a4   :  { %v2819_v31 = vpop.eup %2818 }
 0x8a5   :  { %v678_v34 = vadd.f32 1.0, %v2819_v31 }
 0x8a7   :  { %2820 = vrcp.f32 %v678_v34 }
 0x8b1   :  { %v2821_v41 = vpop.eup %2820 }
 0x8b2   :  { %v681_v45 = vmul.f32 %v2821_v41, %v672_v40  ;;  %v684_v49 = vsub.f32 1.0, %v2821_v41  ;;  %v690_v53 = vmul.f32 %v2821_v41, %v3181_v13 }
 0x8b4   :  { %v682_v46 = vadd.f32 %v681_v45, %v187_v42 }
 0x8b6   :  { %2822 = vtanh.f32 %v682_v46 }
 0x8c0   :  { %v2823_v47 = vpop.eup %2822 }
 0x8c1   :  { %686 = vrot.lane.b32.xlu1 %v2823_v47, %s2923_s25 }
 0x8c5   :  { %52 = vperm.xlu1 %2792, %v17_v48  }
 0x933   :  { %v687_v50 = vpop.permute.xlu1 %686 }
 0x934   :  { %v689_v3 = vmul.f32 %v687_v50, %v684_v49 }
 0x936   :  { %v3207_v56 = vadd.f32 %v690_v53, %v689_v3 }
 0x938   :  { %693 = vrot.lane.b32.xlu0 %v3207_v56, %s2923_s25 }
 0x93c   :  { %113 = vperm.xlu0 %2791, %v17_v48  }
 0x944   :  { %v53_v61 = vpop.permute.xlu1 %52 }
 0x945   :  { %v87_v4 = vmul.f32 %v3083_v54, %v53_v61 }
 0x9aa   :  { %v694_v57 = vpop.permute.xlu0 %693 }
 0x9ab   :  { %2405 = vmatmul.mubr.msk.f32.vlgmr.msra.gmra.mrb[4].mxu1 %vm223_vm0, %v694_v57 }
 0x9ac   :  { %2585 = vmatpush1.bf16.msra.mxu1 %v2967_v9  ;;  %949 = vmatprep.mubr.f32.mxu1 %v2920_v7  ;;  %v86_v9 = vmul.f32 %v3059_v35, %v53_v61 }
 0x9ad   :  { %2587 = vmatprep.subr.bf16.mxu1 %v2969_v10 }
 0x9b0   :  { %2589 = vmatpush1.bf16.msra.mxu1 %v2988_v15 }
 0x9b1   :  { %2591 = vmatprep.subr.bf16.mxu1 %v2992_v16 }
 0x9b4   :  { %2593 = vmatpush1.bf16.msra.mxu1 %v3011_v22 }
 0x9b5   :  { %2595 = vmatprep.subr.bf16.mxu1 %v3015_v23 }
 0x9b8   :  { %2597 = vmatpush1.bf16.msra.mxu1 %v3025_v27 }
 0x9bb   :  { %v114_v60 = vpop.permute.xlu0 %113 }
 0x9bc   :  { %v145_v62 = vmul.f32 %v3062_v36, %v114_v60  ;;  %v146_v27 = vmul.f32 %v3086_v55, %v114_v60 }
 0x9be   :  { %v161_v63 = vadd.f32 %v145_v62, %v86_v9  ;;  %v162_v5 = vadd.f32 %v146_v27, %v87_v4 }
 0x9c0   :  { %v188_v10 = vadd.f32 %v3073_v43, %v161_v63  ;;  %v189_v14 = vadd.f32 %v3094_v59, %v162_v5  ;;  %v19_v63 = vld [vmem:[%s3678_s0 + $0x38] sm:$0xff]  ;;  %s2924_s0 = smov 96  }
 0xa7e   :  { %v763_v0 = vpop.f32.mrb[4].mxu1 }
 0xa7f   :  { %v764_v15 = vadd.f32 %v763_v0, %v3076_v44  ;;  %v765_v1 = vpop.f32.mrb[5].mxu1 }
 0xa80   :  { %v766_v6 = vadd.f32 %v765_v1, %v3091_v58 }
 0xa81   :  { %v768_v16 = vadd.f32 %v764_v15, %v188_v10 }
 0xa83   :  { %v2406_v2 = vmul.f32 -1.442695, %v768_v16 }
 0xa85   :  { %2824 = vpow2.f32 %v2406_v2 }
 0xa8f   :  { %v2825_v22 = vpop.eup %2824 }
 0xa90   :  { %v772_v23 = vadd.f32 1.0, %v2825_v22 }
 0xa92   :  { %2826 = vrcp.f32 %v772_v23 }
 0xa9c   :  { %v2827_v11 = vpop.eup %2826 }
 0xa9d   :  { %v775_v17 = vmul.f32 %v2827_v11, %v766_v6  ;;  %v778_v21 = vsub.f32 1.0, %v2827_v11  ;;  %v784_v25 = vmul.f32 %v2827_v11, %v3207_v56 }
 0xa9f   :  { %v776_v18 = vadd.f32 %v775_v17, %v189_v14 }
 0xaa1   :  { %2828 = vtanh.f32 %v776_v18 }
 0xaab   :  { %v2829_v19 = vpop.eup %2828 }
 0xaac   :  { %780 = vrot.lane.b32.xlu1 %v2829_v19, %s2923_s25 }
 0xab0   :  { %57 = vperm.xlu1 %2792, %v18_v20  }
 0xb1e   :  { %v781_v24 = vpop.permute.xlu1 %780 }
 0xb1f   :  { %v783_v26 = vmul.f32 %v781_v24, %v778_v21 }
 0xb21   :  { %v3233_v28 = vadd.f32 %v784_v25, %v783_v26 }
 0xb23   :  { %787 = vrot.lane.b32.xlu0 %v3233_v28, %s2923_s25 }
 0xb27   :  { %117 = vperm.xlu0 %2791, %v18_v20  }
 0xb2f   :  { %v58_v31 = vpop.permute.xlu1 %57 }
 0xb30   :  { %v88_v37 = vmul.f32 %v3059_v35, %v58_v31  ;;  %v89_v50 = vmul.f32 %v3083_v54, %v58_v31 }
 0xb95   :  { %v788_v29 = vpop.permute.xlu0 %787 }
 0xb96   :  { %2407 = vmatmul.mubr.msk.f32.vlgmr.msra.gmra.mrb[6].mxu0 %vm223_vm0, %v788_v29 }
 0xb97   :  { %1141 = vmatprep.mubr.f32.mxu0 %v2920_v7 }
 0xba6   :  { %v118_v30 = vpop.permute.xlu0 %117 }
 0xba7   :  { %v147_v34 = vmul.f32 %v3062_v36, %v118_v30  ;;  %v148_v49 = vmul.f32 %v3086_v55, %v118_v30 }
 0xba9   :  { %v163_v38 = vadd.f32 %v147_v34, %v88_v37  ;;  %v164_v53 = vadd.f32 %v148_v49, %v89_v50  ;;  %v1008_v37 = vld [vmem:[%s3679_s1 + $0x98] sm:$0xff]  ;;  %v1011_v49 = vld [vmem:[%s3679_s1 + $0xb0] sm:$0xff]  ;;  %v1013_v50 = vld [vmem:[%s3679_s1 + $0xc0] sm:$0xff] }
 0xbab   :  { %v190_v40 = vadd.f32 %v3073_v43, %v163_v38  ;;  %v191_v60 = vadd.f32 %v3094_v59, %v164_v53  ;;  %v1010_v38 = vld [vmem:[%s3679_s1 + $0xa8] sm:$0xff]  ;;  %v1016_v53 = vld [vmem:[%s3679_s1 + $0xd8] sm:$0xff] }
 0xc69   :  { %v857_v39 = vpop.f32.mrb[6].mxu0 }
 0xc6a   :  { %v858_v41 = vadd.f32 %v857_v39, %v3076_v44  ;;  %v859_v42 = vpop.f32.mrb[7].mxu0  ;;  %v1007_v39 = vld [vmem:[%s3679_s1 + $0x90] sm:$0xff] }
 0xc6b   :  { %v860_v3 = vadd.f32 %v859_v42, %v3091_v58  ;;  %v1012_v42 = vld [vmem:[%s3679_s1 + $0xb8] sm:$0xff] }
 0xc6c   :  { %v862_v45 = vadd.f32 %v858_v41, %v190_v40  ;;  %v2598_v40 = vpack.c.bf16 %v1010_v38, %v1008_v37  ;;  %v1009_v41 = vld [vmem:[%s3679_s1 + $0xa0] sm:$0xff] }
 0xc6e   :  { %v2408_v46 = vmul.f32 -1.442695, %v862_v45  ;;  %v1014_v45 = vld [vmem:[%s3679_s1 + $0xc8] sm:$0xff]  ;;  %2599 = vmatprep.subr.bf16.mxu0 %v2598_v40 }
 0xc70   :  { %2830 = vpow2.f32 %v2408_v46 }
 0xc7a   :  { %v2831_v47 = vpop.eup %2830 }
 0xc7b   :  { %v866_v48 = vadd.f32 1.0, %v2831_v47  ;;  %v2600_v47 = vpack.c.bf16 %v1009_v41, %v1007_v39 }
 0xc7d   :  { %2832 = vrcp.f32 %v866_v48  ;;  %v2602_v48 = vpack.c.bf16 %v1014_v45, %v1012_v42  ;;  %2601 = vmatpush1.bf16.msra.mxu0 %v2600_v47 }
 0xc7f   :  { %2603 = vmatprep.subr.bf16.mxu0 %v2602_v48 }
 0xc87   :  { %v2833_v57 = vpop.eup %2832 }
 0xc88   :  { %v869_v61 = vmul.f32 %v2833_v57, %v860_v3  ;;  %v872_v0 = vsub.f32 1.0, %v2833_v57  ;;  %v878_v15 = vmul.f32 %v2833_v57, %v3233_v28  ;;  %v1018_v57 = vld [vmem:[%s3679_s1 + $0xe8] sm:$0xff] }
 0xc8a   :  { %v870_v62 = vadd.f32 %v869_v61, %v191_v60  ;;  %v2604_v60 = vpack.c.bf16 %v1013_v50, %v1011_v49  ;;  %v2606_v61 = vpack.c.bf16 %v1018_v57, %v1016_v53  ;;  %v2411_v50 = vld [vmem:[%s3679_s1 + $0x4] ss:$8 sm:$0x3] }
 0xc8b   :  { %v1029_v53 = vrot.slane %v2411_v50, %v3050_v32 }
 0xc8c   :  { %2834 = vtanh.f32 %v870_v62  ;;  %2605 = vmatpush1.bf16.msra.mxu0 %v2604_v60 }
 0xc8d   :  { %2607 = vmatprep.subr.bf16.mxu0 %v2606_v61 }
 0xc96   :  { %v2835_v9 = vpop.eup %2834 }
 0xc97   :  { %874 = vrot.lane.b32.xlu1 %v2835_v9, %s2923_s25 }
 0xc9b   :  { %62 = vperm.xlu1 %2792, %v19_v63  }
 0xd09   :  { %v875_v10 = vpop.permute.xlu1 %874 }
 0xd0a   :  { %v877_v1 = vmul.f32 %v875_v10, %v872_v0 }
 0xd0c   :  { %v3252_v16 = vadd.f32 %v878_v15, %v877_v1 }
 0xd0e   :  { %881 = vrot.lane.b32.xlu0 %v3252_v16, %s2923_s25 }
 0xd12   :  { %121 = vperm.xlu0 %2791, %v19_v63  }
 0xd16   :  { %2793 = vset.pattern.permute.xlu0 %v2921_v8 }
 0xd1a   :  { %v63_v23 = vpop.permute.xlu1 %62 }
 0xd1b   :  { %v90_v4 = vmul.f32 %v3059_v35, %v63_v23  ;;  %v91_v24 = vmul.f32 %v3083_v54, %v63_v23 }
 0xd80   :  { %v882_v2 = vpop.permute.xlu0 %881 }
 0xd81   :  { %2409 = vmatmul.mubr.msk.f32.vlgmr.msra.gmra.mrb[6].mxu1 %vm223_vm0, %v882_v2 }
 0xd82   :  { %1398 = vmatprep.mubr.f32.mxu1 %v2920_v7 }
 0xd91   :  { %v122_v22 = vpop.permute.xlu0 %121 }
 0xd92   :  { %v149_v27 = vmul.f32 %v3062_v36, %v122_v22  ;;  %v150_v21 = vmul.f32 %v3086_v55, %v122_v22 }
 0xd94   :  { %v165_v5 = vadd.f32 %v149_v27, %v90_v4  ;;  %v166_v36 = vadd.f32 %v150_v21, %v91_v24  ;;  %v1308_v4 = vld [vmem:[%s3679_s1 + $0x138] sm:$0xff]  ;;  %v1313_v21 = vld [vmem:[%s3679_s1 + $0x160] sm:$0xff] }
 0xd96   :  { %v192_v11 = vadd.f32 %v3073_v43, %v165_v5  ;;  %v193_v26 = vadd.f32 %v3094_v59, %v166_v36  ;;  %v1310_v5 = vld [vmem:[%s3679_s1 + $0x148] sm:$0xff]  ;;  %v1316_v36 = vld [vmem:[%s3679_s1 + $0x178] sm:$0xff] }
 0xe54   :  { %v951_v6 = vpop.f32.mrb[6].mxu1 }
 0xe55   :  { %v952_v14 = vadd.f32 %v951_v6, %v3076_v44  ;;  %v953_v17 = vpop.f32.mrb[7].mxu1  ;;  %v3353_v6 = vpack.c.bf16 %v1310_v5, %v1308_v4 }
 0xe56   :  { %v954_v35 = vadd.f32 %v953_v17, %v3091_v58 }
 0xe57   :  { %v956_v18 = vadd.f32 %v952_v14, %v192_v11  ;;  %v1307_v11 = vld [vmem:[%s3679_s1 + $0x130] sm:$0xff]  ;;  %v1309_v14 = vld [vmem:[%s3679_s1 + $0x140] sm:$0xff] }
 0xe58   :  { %v3361_v17 = vpack.c.bf16 %v1309_v14, %v1307_v11  ;;  %v2428_v11 = vld [vmem:[%s3679_s1 + $0x5] ss:$8 sm:$0x3] }
 0xe59   :  { %v2410_v8 = vmul.f32 -1.442695, %v956_v18  ;;  %v1312_v18 = vld [vmem:[%s3679_s1 + $0x158] sm:$0xff] }
 0xe5b   :  { %2836 = vpow2.f32 %v2410_v8  ;;  %v1314_v8 = vld [vmem:[%s3679_s1 + $0x168] sm:$0xff] }
 0xe65   :  { %v2837_v19 = vpop.eup %2836 }
 0xe66   :  { %v960_v20 = vadd.f32 1.0, %v2837_v19  ;;  %v3371_v19 = vpack.c.bf16 %v1314_v8, %v1312_v18 }
 0xe68   :  { %2838 = vrcp.f32 %v960_v20  ;;  %v1311_v20 = vld [vmem:[%s3679_s1 + $0x150] sm:$0xff] }
 0xe69   :  { %v3379_v24 = vpack.c.bf16 %v1313_v21, %v1311_v20  ;;  %v3504_v20 = vrot.slane %v2428_v11, %v3050_v32 }
 0xe72   :  { %v2839_v25 = vpop.eup %2838 }
 0xe73   :  { %v963_v43 = vmul.f32 %v2839_v25, %v954_v35  ;;  %v966_v54 = vsub.f32 1.0, %v2839_v25  ;;  %v972_v58 = vmul.f32 %v2839_v25, %v3252_v16  ;;  %v1318_v35 = vld [vmem:[%s3679_s1 + $0x188] sm:$0xff] }
 0xe74   :  { %v3389_v25 = vpack.c.bf16 %v1318_v35, %v1316_v36 }
 0xe75   :  { %v964_v29 = vadd.f32 %v963_v43, %v193_v26  ;;  %v1315_v26 = vld [vmem:[%s3679_s1 + $0x170] sm:$0xff]  ;;  %v1317_v43 = vld [vmem:[%s3679_s1 + $0x180] sm:$0xff] }
 0xe77   :  { %2840 = vtanh.f32 %v964_v29  ;;  %v3397_v29 = vpack.c.bf16 %v1317_v43, %v1315_v26 }
 0xe81   :  { %v2841_v44 = vpop.eup %2840 }
 0xe82   :  { %968 = vrot.lane.b32.xlu1 %v2841_v44, %s2923_s25  ;;  %v1015_v44 = vld [vmem:[%s3679_s1 + $0xd0] sm:$0xff] }
 0xe86   :  { %979 = vrot.lane.b32.xlu1 %v3252_v16, %s2924_s0 }
 0xe8a   :  { %987 = vrot.lane.b32.xlu1 %v3207_v56, %s2924_s0 }
 0xe8e   :  { %995 = vrot.lane.b32.xlu1 %v3154_v33, %s2924_s0 }
 0xe92   :  { %1003 = vrot.lane.b32.xlu1 %v3099_v12, %s2924_s0 }
 0xef4   :  { %v969_v55 = vpop.permute.xlu1 %968 }
 0xef5   :  { %v971_v59 = vmul.f32 %v969_v55, %v966_v54  ;;  %v1017_v54 = vld [vmem:[%s3679_s1 + $0xe0] sm:$0xff]  ;;  %v1020_v55 = vld [vmem:[%s3679_s1 + $0xf8] sm:$0xff] }
 0xef7   :  { %v973_v30 = vadd.f32 %v972_v58, %v971_v59  ;;  %v1022_v58 = vld [vmem:[%s3679_s1 + $0x108] sm:$0xff]  ;;  %v2608_v59 = vpack.c.bf16 %v1017_v54, %v1015_v44 }
 0xef8   :  { %v980_v31 = vpop.permute.xlu1 %979 }
 0xef9   :  { %v982_v34 = vadd.f32 %v980_v31, %v3127_v52  ;;  %975 = vrot.lane.b32.xlu0 %v973_v30, %s2924_s0  ;;  %v1019_v31 = vld [vmem:[%s3679_s1 + $0xf0] sm:$0xff] }
 0xefb   :  { %1046 = vrot.lane.b32.xlu1 %v982_v34, %s2923_s25  ;;  %v1021_v34 = vld [vmem:[%s3679_s1 + $0x100] sm:$0xff] }
 0xefc   :  { %v988_v46 = vpop.permute.xlu1 %987  ;;  %v2612_v38 = vpack.c.bf16 %v1021_v34, %v1019_v31  ;;  %v3508_v34 = vrot.slane %v2428_v11, %v3080_v51 }
 0xefd   :  { %v990_v3 = vadd.f32 %v988_v46, %v3181_v13  ;;  %983 = vrot.lane.b32.xlu0 %v3233_v28, %s2924_s0 }
 0xeff   :  { %1050 = vrot.lane.b32.xlu1 %v990_v3, %s2923_s25  ;;  %v1033_v3 = vrot.slane %v2411_v50, %v3080_v51 }
 0xf00   :  { %v996_v62 = vpop.permute.xlu1 %995 }
 0xf01   :  { %v998_v9 = vadd.f32 %v996_v62, %v3233_v28  ;;  %991 = vrot.lane.b32.xlu0 %v3181_v13, %s2924_s0 }
 0xf03   :  { %1054 = vrot.lane.b32.xlu1 %v998_v9, %s2923_s25 }
 0xf04   :  { %v1004_v63 = vpop.permute.xlu1 %1003 }
 0xf05   :  { %v1006_v0 = vadd.f32 %v1004_v63, %v973_v30  ;;  %999 = vrot.lane.b32.xlu0 %v3127_v52, %s2924_s0  ;;  %v2610_v30 = vpack.c.bf16 %v1022_v58, %v1020_v55 }
 0xf07   :  { %1058 = vrot.lane.b32.xlu1 %v1006_v0, %s2923_s25 }
 0xf6b   :  { %v976_v10 = vpop.permute.xlu0 %975 }
 0xf6c   :  { %v978_v15 = vadd.f32 %v976_v10, %v3099_v12  ;;  %v1304_v12 = vld [vmem:[%s3679_s1 + $0x118] sm:$0xff] }
 0xf6d   :  { %v1047_v39 = vpop.permute.xlu1 %1046 }
 0xf6e   :  { %1044 = vrot.lane.b32.xlu0 %v978_v15, %s2923_s25 }
 0xf6f   :  { %v984_v28 = vpop.permute.xlu0 %983 }
 0xf70   :  { %v986_v1 = vadd.f32 %v984_v28, %v3154_v33  ;;  %v1306_v33 = vld [vmem:[%s3679_s1 + $0x128] sm:$0xff] }
 0xf71   :  { %v3335_v23 = vpack.c.bf16 %v1306_v33, %v1304_v12  ;;  %v1051_v41 = vpop.permute.xlu1 %1050 }
 0xf72   :  { %1048 = vrot.lane.b32.xlu0 %v986_v1, %s2923_s25 }
 0xf73   :  { %v992_v13 = vpop.permute.xlu0 %991  ;;  %2615 = vmatprep.subr.bf16.mxu1 %v3335_v23 }
 0xf74   :  { %v994_v2 = vadd.f32 %v992_v13, %v3207_v56  ;;  %v1303_v56 = vld [vmem:[%s3679_s1 + $0x110] sm:$0xff] }
 0xf75   :  { %v1055_v45 = vpop.permute.xlu1 %1054 }
 0xf76   :  { %1052 = vrot.lane.b32.xlu0 %v994_v2, %s2923_s25 }
 0xf77   :  { %v1000_v22 = vpop.permute.xlu0 %999 }
 0xf78   :  { %v1002_v52 = vadd.f32 %v1000_v22, %v3252_v16  ;;  %v1305_v16 = vld [vmem:[%s3679_s1 + $0x120] sm:$0xff] }
 0xf79   :  { %v3343_v27 = vpack.c.bf16 %v1305_v16, %v1303_v56  ;;  %v1059_v47 = vpop.permute.xlu1 %1058 }
 0xf7a   :  { %1056 = vrot.lane.b32.xlu0 %v1002_v52, %s2923_s25 }
 0xf7b   :  { %2617 = vmatpush1.bf16.msra.mxu1 %v3343_v27 }
 0xf7c   :  { %2619 = vmatprep.subr.bf16.mxu1 %v3353_v6 }
 0xf7f   :  { %2621 = vmatpush1.bf16.msra.mxu1 %v3361_v17 }
 0xf80   :  { %2623 = vmatprep.subr.bf16.mxu1 %v3371_v19 }
 0xf83   :  { %2625 = vmatpush1.bf16.msra.mxu1 %v3379_v24 }
 0xf84   :  { %2627 = vmatprep.subr.bf16.mxu1 %v3389_v25 }
 0xf87   :  { %2629 = vmatpush1.bf16.msra.mxu1 %v3397_v29 }
 0xf88   :  { %2631 = vmatprep.subr.bf16.mxu1 %v3335_v23 }
 0xf8a   :  { %1399 = vmatmul.mubr.f32.vlgmr.msra.gmra.mrb[8].mxu1 %v2920_v7 }
 0xf8b   :  { %2633 = vmatpush1.bf16.msra.mxu1 %v3343_v27  ;;  %1494 = vmatprep.mubr.f32.mxu1 %v2920_v7 }
 0xf8c   :  { %2635 = vmatprep.subr.bf16.mxu1 %v3353_v6 }
 0xf8f   :  { %2637 = vmatpush1.bf16.msra.mxu1 %v3361_v17 }
 0xf90   :  { %2639 = vmatprep.subr.bf16.mxu1 %v3371_v19 }
 0xf93   :  { %2641 = vmatpush1.bf16.msra.mxu1 %v3379_v24 }
 0xf94   :  { %2643 = vmatprep.subr.bf16.mxu1 %v3389_v25 }
 0xf97   :  { %2645 = vmatpush1.bf16.msra.mxu1 %v3397_v29 }
 0xf98   :  { %2647 = vmatprep.subr.bf16.mxu1 %v3335_v23 }
 0xfe0   :  { %v1045_v37 = vpop.permute.xlu0 %1044 }
 0xfe1   :  { %2412 = vmatmul.mubr.msk.f32.vlgmr.msra.gmra.mrb[8].mxu0 %vm1060_vm1, %v1045_v37 }
 0xfe2   :  { %2609 = vmatpush1.bf16.msra.mxu0 %v2608_v59  ;;  %1147 = vmatprep.mubr.f32.mxu0 %v2920_v7 }
 0xfe3   :  { %2611 = vmatprep.subr.bf16.mxu0 %v2610_v30 }
 0xfe4   :  { %v1049_v40 = vpop.permute.xlu0 %1048 }
 0xfe5   :  { %2413 = vmatmul.mubr.msk.f32.gmra.mrb[10].mxu0 %vm1060_vm1, %v1047_v39 }
 0xfe6   :  { %1153 = vmatprep.mubr.f32.mxu0 %v2920_v7  ;;  %2613 = vmatpush1.bf16.msra.mxu0 %v2612_v38 }
 0xfe7   :  { %2679 = vmatprep.subr.bf16.mxu0 %v3335_v23 }
 0xfe8   :  { %v1053_v42 = vpop.permute.xlu0 %1052 }
 0xfe9   :  { %2414 = vmatmul.mubr.msk.f32.gmra.mrb[12].mxu0 %vm1060_vm1, %v1049_v40 }
 0xfea   :  { %1159 = vmatprep.mubr.f32.mxu0 %v2920_v7 }
 0xfec   :  { %v1057_v46 = vpop.permute.xlu0 %1056 }
 0xfed   :  { %2415 = vmatmul.mubr.msk.f32.gmra.mrb[14].mxu0 %vm1060_vm1, %v1051_v41 }
 0xfee   :  { %1165 = vmatprep.mubr.f32.mxu0 %v2920_v7 }
 0xff1   :  { %2416 = vmatmul.mubr.msk.f32.gmra.mrb[16].mxu0 %vm1060_vm1, %v1053_v42 }
 0xff2   :  { %1171 = vmatprep.mubr.f32.mxu0 %v2920_v7 }
 0xff5   :  { %2417 = vmatmul.mubr.msk.f32.gmra.mrb[18].mxu0 %vm1060_vm1, %v1055_v45 }
 0xff6   :  { %1177 = vmatprep.mubr.f32.mxu0 %v2920_v7 }
 0xff9   :  { %2418 = vmatmul.mubr.msk.f32.gmra.mrb[20].mxu0 %vm1060_vm1, %v1057_v46 }
 0xffa   :  { %1183 = vmatprep.mubr.f32.mxu0 %v2920_v7 }
 0xffd   :  { %2419 = vmatmul.mubr.msk.f32.gmra.mrb[22].mxu0 %vm1060_vm1, %v1059_v47 }
 0xffe   :  { %1254 = vmatprep.mubr.f32.mxu0 %v2920_v7 }
0x1005   :  { %2420 = vmatmul.mubr.msk.f32.vlgmr.msra.gmra.mrb[22].mxu0 %vm1060_vm1, %v1045_v37 }
0x1006   :  { %1260 = vmatprep.mubr.f32.mxu0 %v2920_v7  ;;  %2681 = vmatpush1.bf16.msra.mxu0 %v3343_v27 }
0x1007   :  { %2683 = vmatprep.subr.bf16.mxu0 %v3353_v6 }
0x1009   :  { %2421 = vmatmul.mubr.msk.f32.gmra.mrb[20].mxu0 %vm1060_vm1, %v1047_v39 }
0x100a   :  { %1266 = vmatprep.mubr.f32.mxu0 %v2920_v7  ;;  %2685 = vmatpush1.bf16.msra.mxu0 %v3361_v17 }
0x100b   :  { %2687 = vmatprep.subr.bf16.mxu0 %v3371_v19 }
0x100d   :  { %2422 = vmatmul.mubr.msk.f32.gmra.mrb[18].mxu0 %vm1060_vm1, %v1049_v40 }
0x100e   :  { %1272 = vmatprep.mubr.f32.mxu0 %v2920_v7  ;;  %2689 = vmatpush1.bf16.msra.mxu0 %v3379_v24 }
0x100f   :  { %2691 = vmatprep.subr.bf16.mxu0 %v3389_v25 }
0x1011   :  { %2423 = vmatmul.mubr.msk.f32.gmra.mrb[16].mxu0 %vm1060_vm1, %v1051_v41 }
0x1012   :  { %1278 = vmatprep.mubr.f32.mxu0 %v2920_v7  ;;  %2693 = vmatpush1.bf16.msra.mxu0 %v3397_v29 }
0x1013   :  { %2711 = vmatprep.subr.bf16.mxu0 %v3335_v23 }
0x1015   :  { %2424 = vmatmul.mubr.msk.f32.gmra.mrb[14].mxu0 %vm1060_vm1, %v1053_v42 }
0x1016   :  { %1284 = vmatprep.mubr.f32.mxu0 %v2920_v7 }
0x1019   :  { %2425 = vmatmul.mubr.msk.f32.gmra.mrb[12].mxu0 %vm1060_vm1, %v1055_v45 }
0x101a   :  { %1290 = vmatprep.mubr.f32.mxu0 %v2920_v7 }
0x101d   :  { %2426 = vmatmul.mubr.msk.f32.gmra.mrb[10].mxu0 %vm1060_vm1, %v1057_v46 }
0x101e   :  { %1296 = vmatprep.mubr.f32.mxu0 %v2920_v7 }
0x1021   :  { %2427 = vmatmul.mubr.msk.f32.gmra.mrb[8].mxu0 %vm1060_vm1, %v1059_v47 }
0x1022   :  { %1782 = vmatprep.mubr.f32.mxu0 %v2920_v7 }
0x105d   :  { %v1400_v48 = vpop.f32.mrb[8].mxu1 }
0x105e   :  { %v1402_v49 = vpop.f32.mrb[9].mxu1  ;;  %v1401_v43 = vadd.f32 %v1400_v48, %v3504_v20 }
0x105f   :  { %v1403_v32 = vadd.f32 %v1402_v49, %v3508_v34 }
0x10d8   :  { %v1256_v57 = vpop.f32.mrb[22].mxu0 }
0x10d9   :  { %v3476_v60 = vadd.f32 %v1256_v57, %v1029_v53  ;;  %v1258_v61 = vpop.f32.mrb[23].mxu0 }
0x10da   :  { %v3478_v62 = vadd.f32 %v1258_v61, %v1033_v3 }
0x10dc   :  { %v1262_v9 = vpop.f32.mrb[20].mxu0 }
0x10dd   :  { %v3480_v63 = vadd.f32 %v1262_v9, %v1029_v53  ;;  %v1264_v0 = vpop.f32.mrb[21].mxu0 }
0x10de   :  { %v3482_v10 = vadd.f32 %v1264_v0, %v1033_v3 }
0x10e0   :  { %v1268_v15 = vpop.f32.mrb[18].mxu0 }
0x10e1   :  { %v3484_v28 = vadd.f32 %v1268_v15, %v1029_v53  ;;  %v1270_v1 = vpop.f32.mrb[19].mxu0 }
0x10e2   :  { %v3486_v13 = vadd.f32 %v1270_v1, %v1033_v3 }
0x10e4   :  { %v1274_v2 = vpop.f32.mrb[16].mxu0 }
0x10e5   :  { %v3488_v22 = vadd.f32 %v1274_v2, %v1029_v53  ;;  %v1276_v52 = vpop.f32.mrb[17].mxu0 }
0x10e6   :  { %v3490_v12 = vadd.f32 %v1276_v52, %v1033_v3 }
0x10e8   :  { %v1280_v33 = vpop.f32.mrb[14].mxu0 }
0x10e9   :  { %v3492_v56 = vadd.f32 %v1280_v33, %v1029_v53  ;;  %v1282_v16 = vpop.f32.mrb[15].mxu0 }
0x10ea   :  { %v3494_v4 = vadd.f32 %v1282_v16, %v1033_v3 }
0x10ec   :  { %v1286_v5 = vpop.f32.mrb[12].mxu0 }
0x10ed   :  { %v3499_v14 = vadd.f32 %v1286_v5, %v1029_v53  ;;  %v1288_v18 = vpop.f32.mrb[13].mxu0 }
0x10ee   :  { %v3501_v8 = vadd.f32 %v1288_v18, %v1033_v3 }
0x10f0   :  { %v1292_v21 = vpop.f32.mrb[10].mxu0 }
0x10f1   :  { %v2750_v36 = vadd.f32 %v1292_v21, %v1029_v53  ;;  %v1294_v35 = vpop.f32.mrb[11].mxu0 }
0x10f2   :  { %v2751_v26 = vadd.f32 %v1294_v35, %v1033_v3 }
0x10f4   :  { %v1298_v44 = vpop.f32.mrb[8].mxu0 }
0x10f5   :  { %v2748_v54 = vadd.f32 %v1298_v44, %v1029_v53  ;;  %v1300_v55 = vpop.f32.mrb[9].mxu0 }
0x10f6   :  { %v2749_v39 = vadd.f32 %v1300_v55, %v1033_v3 }
0x10f7   :  { %v1405_v58 = vadd.f32 %v2748_v54, %v1401_v43 }
0x10f9   :  { %v2429_v59 = vmul.f32 -1.442695, %v1405_v58 }
0x10fb   :  { %2842 = vpow2.f32 %v2429_v59 }
0x1105   :  { %v2843_v30 = vpop.eup %2842 }
0x1106   :  { %v1409_v31 = vadd.f32 1.0, %v2843_v30 }
0x1108   :  { %2844 = vrcp.f32 %v1409_v31 }
0x1112   :  { %v2845_v37 = vpop.eup %2844 }
0x1113   :  { %v1412_v38 = vmul.f32 %v2845_v37, %v1403_v32  ;;  %v1415_v42 = vsub.f32 1.0, %v2845_v37  ;;  %v1421_v46 = vmul.f32 0.0, %v2845_v37 }
0x1115   :  { %v1413_v40 = vadd.f32 %v2749_v39, %v1412_v38 }
0x1117   :  { %2846 = vtanh.f32 %v1413_v40 }
0x1121   :  { %v2847_v41 = vpop.eup %2846 }
0x1122   :  { %1417 = vrot.lane.b32.xlu0 %v2847_v41, %s2923_s25 }
0x1194   :  { %v1418_v45 = vpop.permute.xlu0 %1417 }
0x1195   :  { %v1420_v47 = vmul.f32 %v1418_v45, %v1415_v42 }
0x1197   :  { %v1422_v48 = vadd.f32 %v1421_v46, %v1420_v47 }
0x1199   :  { %1426 = vrot.lane.b32.xlu1 %v1422_v48, %s2923_s25 }
0x120b   :  { %v1427_v50 = vpop.permute.xlu1 %1426 }
0x120c   :  { %2430 = vmatmul.mubr.msk.f32.vlgmr.msra.gmra.mrb[10].mxu1 %vm223_vm0, %v1427_v50 }
0x120d   :  { %2649 = vmatpush1.bf16.msra.mxu1 %v3343_v27  ;;  %1590 = vmatprep.mubr.f32.mxu1 %v2920_v7 }
0x120e   :  { %2651 = vmatprep.subr.bf16.mxu1 %v3353_v6 }
0x1211   :  { %2653 = vmatpush1.bf16.msra.mxu1 %v3361_v17 }
0x1212   :  { %2655 = vmatprep.subr.bf16.mxu1 %v3371_v19 }
0x1215   :  { %2657 = vmatpush1.bf16.msra.mxu1 %v3379_v24 }
0x1216   :  { %2659 = vmatprep.subr.bf16.mxu1 %v3389_v25 }
0x1219   :  { %2661 = vmatpush1.bf16.msra.mxu1 %v3397_v29 }
0x121a   :  { %2663 = vmatprep.subr.bf16.mxu1 %v3335_v23 }
0x12df   :  { %v1496_v51 = vpop.f32.mrb[10].mxu1 }
0x12e0   :  { %v1497_v49 = vadd.f32 %v1496_v51, %v3504_v20  ;;  %v1498_v53 = vpop.f32.mrb[11].mxu1 }
0x12e1   :  { %v1499_v0 = vadd.f32 %v1498_v53, %v3508_v34 }
0x12e2   :  { %v1501_v3 = vadd.f32 %v2750_v36, %v1497_v49 }
0x12e4   :  { %v2431_v57 = vmul.f32 -1.442695, %v1501_v3 }
0x12e6   :  { %2848 = vpow2.f32 %v2431_v57 }
0x12f0   :  { %v2849_v61 = vpop.eup %2848 }
0x12f1   :  { %v1505_v9 = vadd.f32 1.0, %v2849_v61 }
0x12f3   :  { %2850 = vrcp.f32 %v1505_v9 }
0x12fd   :  { %v2851_v15 = vpop.eup %2850 }
0x12fe   :  { %v1508_v1 = vmul.f32 %v2851_v15, %v1499_v0  ;;  %v1511_v33 = vsub.f32 1.0, %v2851_v15  ;;  %v1517_v5 = vmul.f32 %v2851_v15, %v1422_v48 }
0x1300   :  { %v1509_v2 = vadd.f32 %v2751_v26, %v1508_v1 }
0x1302   :  { %2852 = vtanh.f32 %v1509_v2 }
0x130c   :  { %v2853_v52 = vpop.eup %2852 }
0x130d   :  { %1513 = vrot.lane.b32.xlu0 %v2853_v52, %s2923_s25 }
0x137f   :  { %v1514_v16 = vpop.permute.xlu0 %1513 }
0x1380   :  { %v1516_v11 = vmul.f32 %v1514_v16, %v1511_v33 }
0x1382   :  { %v1518_v18 = vadd.f32 %v1517_v5, %v1516_v11 }
0x1384   :  { %1522 = vrot.lane.b32.xlu1 %v1518_v18, %s2923_s25 }
0x13f6   :  { %v1523_v21 = vpop.permute.xlu1 %1522 }
0x13f7   :  { %2432 = vmatmul.mubr.msk.f32.vlgmr.msra.gmra.mrb[12].mxu1 %vm223_vm0, %v1523_v21 }
0x13f8   :  { %2665 = vmatpush1.bf16.msra.mxu1 %v3343_v27  ;;  %1686 = vmatprep.mubr.f32.mxu1 %v2920_v7 }
0x13f9   :  { %2667 = vmatprep.subr.bf16.mxu1 %v3353_v6 }
0x13fc   :  { %2669 = vmatpush1.bf16.msra.mxu1 %v3361_v17 }
0x13fd   :  { %2671 = vmatprep.subr.bf16.mxu1 %v3371_v19 }
0x1400   :  { %2673 = vmatpush1.bf16.msra.mxu1 %v3379_v24 }
0x1401   :  { %2675 = vmatprep.subr.bf16.mxu1 %v3389_v25 }
0x1404   :  { %2677 = vmatpush1.bf16.msra.mxu1 %v3397_v29 }
0x1405   :  { %2695 = vmatprep.subr.bf16.mxu1 %v3335_v23 }
0x14ca   :  { %v1592_v36 = vpop.f32.mrb[12].mxu1 }
0x14cb   :  { %v1593_v35 = vadd.f32 %v1592_v36, %v3504_v20  ;;  %v1594_v26 = vpop.f32.mrb[13].mxu1 }
0x14cc   :  { %v1595_v58 = vadd.f32 %v1594_v26, %v3508_v34 }
0x14cd   :  { %v1597_v43 = vadd.f32 %v3499_v14, %v1593_v35 }
0x14cf   :  { %v2433_v44 = vmul.f32 -1.442695, %v1597_v43 }
0x14d1   :  { %2854 = vpow2.f32 %v2433_v44 }
0x14db   :  { %v2855_v54 = vpop.eup %2854 }
0x14dc   :  { %v1601_v55 = vadd.f32 1.0, %v2855_v54 }
0x14de   :  { %2856 = vrcp.f32 %v1601_v55 }
0x14e8   :  { %v2857_v59 = vpop.eup %2856 }
0x14e9   :  { %v1604_v30 = vmul.f32 %v2857_v59, %v1595_v58  ;;  %v1607_v37 = vsub.f32 1.0, %v2857_v59  ;;  %v1613_v39 = vmul.f32 %v2857_v59, %v1518_v18 }
0x14eb   :  { %v1605_v31 = vadd.f32 %v3501_v8, %v1604_v30 }
0x14ed   :  { %2858 = vtanh.f32 %v1605_v31 }
0x14f7   :  { %v2859_v32 = vpop.eup %2858 }
0x14f8   :  { %1609 = vrot.lane.b32.xlu0 %v2859_v32, %s2923_s25 }
0x156a   :  { %v1610_v38 = vpop.permute.xlu0 %1609 }
0x156b   :  { %v1612_v40 = vmul.f32 %v1610_v38, %v1607_v37 }
0x156d   :  { %v1614_v14 = vadd.f32 %v1613_v39, %v1612_v40 }
0x156f   :  { %1618 = vrot.lane.b32.xlu1 %v1614_v14, %s2923_s25 }
0x15e1   :  { %v1619_v41 = vpop.permute.xlu1 %1618 }
0x15e2   :  { %2434 = vmatmul.mubr.msk.f32.vlgmr.msra.gmra.mrb[14].mxu1 %vm223_vm0, %v1619_v41 }
0x15e3   :  { %2697 = vmatpush1.bf16.msra.mxu1 %v3343_v27  ;;  %1878 = vmatprep.mubr.f32.mxu1 %v2920_v7 }
0x15e4   :  { %2699 = vmatprep.subr.bf16.mxu1 %v3353_v6 }
0x15e7   :  { %2701 = vmatpush1.bf16.msra.mxu1 %v3361_v17 }
0x15e8   :  { %2703 = vmatprep.subr.bf16.mxu1 %v3371_v19 }
0x15eb   :  { %2705 = vmatpush1.bf16.msra.mxu1 %v3379_v24 }
0x15ec   :  { %2707 = vmatprep.subr.bf16.mxu1 %v3389_v25 }
0x15ef   :  { %2709 = vmatpush1.bf16.msra.mxu1 %v3397_v29 }
0x15f0   :  { %2727 = vmatprep.subr.bf16.mxu1 %v3335_v23 }
0x16b5   :  { %v1688_v8 = vpop.f32.mrb[14].mxu1 }
0x16b6   :  { %v1689_v42 = vadd.f32 %v1688_v8, %v3504_v20  ;;  %v1690_v45 = vpop.f32.mrb[15].mxu1  ;;  %v2103_v8 = vld [vmem:[%s3679_s1 + $0x1c0] sm:$0xff] }
0x16b7   :  { %v1691_v51 = vadd.f32 %v1690_v45, %v3508_v34 }
0x16b8   :  { %v1693_v46 = vadd.f32 %v3492_v56, %v1689_v42  ;;  %v2104_v42 = vld [vmem:[%s3679_s1 + $0x1d0] sm:$0xff] }
0x16ba   :  { %v2435_v47 = vmul.f32 -1.442695, %v1693_v46  ;;  %v2746_v46 = vpack.c.bf16 %v2104_v42, %v2103_v8 }
0x16bc   :  { %2860 = vpow2.f32 %v2435_v47  ;;  %v2100_v47 = vld [vmem:[%s3679_s1 + $0x190] sm:$0xf] }
0x16c6   :  { %v2861_v48 = vpop.eup %2860 }
0x16c7   :  { %v1697_v50 = vadd.f32 1.0, %v2861_v48  ;;  %v2107_v48 = vmul.f32 0.17677669, %v2100_v47 }
0x16c9   :  { %2862 = vrcp.f32 %v1697_v50 }
0x16d3   :  { %v2863_v49 = vpop.eup %2862 }
0x16d4   :  { %v1700_v53 = vmul.f32 %v2863_v49, %v1691_v51  ;;  %v1703_v23 = vsub.f32 1.0, %v2863_v49  ;;  %v1709_v9 = vmul.f32 %v2863_v49, %v1614_v14  ;;  %v2101_v14 = vld [vmem:[%s3679_s1 + $0x1a0] sm:$0xff] }
0x16d6   :  { %v1701_v3 = vadd.f32 %v3494_v4, %v1700_v53 }
0x16d8   :  { %2864 = vtanh.f32 %v1701_v3 }
0x16e2   :  { %v2865_v57 = vpop.eup %2864 }
0x16e3   :  { %1705 = vrot.lane.b32.xlu0 %v2865_v57, %s2923_s25  ;;  %v2105_v57 = vld [vmem:[%s3679_s1 + $0x1e0] sm:$0xf] }
0x1755   :  { %v1706_v61 = vpop.permute.xlu0 %1705 }
0x1756   :  { %v1708_v0 = vmul.f32 %v1706_v61, %v1703_v23 }
0x1758   :  { %v1710_v56 = vadd.f32 %v1709_v9, %v1708_v0 }
0x175a   :  { %1714 = vrot.lane.b32.xlu1 %v1710_v56, %s2923_s25 }
0x17cc   :  { %v1715_v15 = vpop.permute.xlu1 %1714 }
0x17cd   :  { %2436 = vmatmul.mubr.msk.f32.vlgmr.msra.gmra.mrb[24].mxu0 %vm223_vm0, %v1715_v15 }
0x17ce   :  { %2713 = vmatpush1.bf16.msra.mxu0 %v3343_v27  ;;  %1974 = vmatprep.mubr.f32.mxu0 %v2920_v7 }
0x17cf   :  { %2715 = vmatprep.subr.bf16.mxu0 %v3353_v6 }
0x17d2   :  { %2717 = vmatpush1.bf16.msra.mxu0 %v3361_v17 }
0x17d3   :  { %2719 = vmatprep.subr.bf16.mxu0 %v3371_v19 }
0x17d6   :  { %2721 = vmatpush1.bf16.msra.mxu0 %v3379_v24 }
0x17d7   :  { %2723 = vmatprep.subr.bf16.mxu0 %v3389_v25 }
0x17da   :  { %2725 = vmatpush1.bf16.msra.mxu0 %v3397_v29 }
0x18a0   :  { %v1784_v4 = vpop.f32.mrb[24].mxu0 }
0x18a1   :  { %v1785_v1 = vadd.f32 %v1784_v4, %v3504_v20  ;;  %v1786_v2 = vpop.f32.mrb[25].mxu0 }
0x18a2   :  { %v1787_v11 = vadd.f32 %v1786_v2, %v3508_v34 }
0x18a3   :  { %v1789_v52 = vadd.f32 %v3488_v22, %v1785_v1 }
0x18a5   :  { %v2437_v33 = vmul.f32 -1.442695, %v1789_v52 }
0x18a7   :  { %2866 = vpow2.f32 %v2437_v33 }
0x18b1   :  { %v2867_v16 = vpop.eup %2866 }
0x18b2   :  { %v1793_v5 = vadd.f32 1.0, %v2867_v16 }
0x18b4   :  { %2868 = vrcp.f32 %v1793_v5  ;;  %v2106_v5 = vld [vmem:[%s3679_s1 + $0x1f0] ss:$0 sm:$0xff] }
0x18be   :  { %v2869_v18 = vpop.eup %2868 }
0x18bf   :  { %v1796_v21 = vmul.f32 %v2869_v18, %v1787_v11  ;;  %v1799_v26 = vsub.f32 1.0, %v2869_v18  ;;  %v1805_v44 = vmul.f32 %v2869_v18, %v1710_v56 }
0x18c1   :  { %v1797_v36 = vadd.f32 %v3490_v12, %v1796_v21 }
0x18c3   :  { %2870 = vtanh.f32 %v1797_v36 }
0x18cd   :  { %v2871_v35 = vpop.eup %2870 }
0x18ce   :  { %1801 = vrot.lane.b32.xlu0 %v2871_v35, %s2923_s25 }
0x1940   :  { %v1802_v43 = vpop.permute.xlu0 %1801 }
0x1941   :  { %v1804_v54 = vmul.f32 %v1802_v43, %v1799_v26 }
0x1943   :  { %v1806_v22 = vadd.f32 %v1805_v44, %v1804_v54 }
0x1945   :  { %1810 = vrot.lane.b32.xlu1 %v1806_v22, %s2923_s25 }
0x19b7   :  { %v1811_v55 = vpop.permute.xlu1 %1810 }
0x19b8   :  { %2438 = vmatmul.mubr.msk.f32.vlgmr.msra.gmra.mrb[16].mxu1 %vm223_vm0, %v1811_v55 }
0x19b9   :  { %2729 = vmatpush1.bf16.msra.mxu1 %v3343_v27  ;;  %2070 = vmatprep.mubr.f32.mxu1 %v2920_v7 }
0x19ba   :  { %2731 = vmatprep.subr.bf16.mxu1 %v3353_v6 }
0x19bd   :  { %2733 = vmatpush1.bf16.msra.mxu1 %v3361_v17 }
0x19be   :  { %2735 = vmatprep.subr.bf16.mxu1 %v3371_v19 }
0x19c1   :  { %2737 = vmatpush1.bf16.msra.mxu1 %v3379_v24 }
0x19c2   :  { %2739 = vmatprep.subr.bf16.mxu1 %v3389_v25  ;;  %v2925_v25 = vmov 0.0|0.0  }
0x19c3   :  { %2742 = vmatprep.subr.bf16.mxu0 %v2925_v25 }
0x19c5   :  { %2741 = vmatpush1.bf16.msra.mxu1 %v3397_v29 }
0x1a8b   :  { %v1880_v12 = vpop.f32.mrb[16].mxu1 }
0x1a8c   :  { %v1881_v58 = vadd.f32 %v1880_v12, %v3504_v20  ;;  %v1882_v59 = vpop.f32.mrb[17].mxu1 }
0x1a8d   :  { %v1883_v17 = vadd.f32 %v1882_v59, %v3508_v34 }
0x1a8e   :  { %v1885_v27 = vadd.f32 %v3484_v28, %v1881_v58 }
0x1a90   :  { %v2439_v30 = vmul.f32 -1.442695, %v1885_v27 }
0x1a92   :  { %2872 = vpow2.f32 %v2439_v30 }
0x1a9c   :  { %v2873_v31 = vpop.eup %2872 }
0x1a9d   :  { %v1889_v6 = vadd.f32 1.0, %v2873_v31 }
0x1a9f   :  { %2874 = vrcp.f32 %v1889_v6 }
0x1aa9   :  { %v2875_v19 = vpop.eup %2874 }
0x1aaa   :  { %v1892_v32 = vmul.f32 %v2875_v19, %v1883_v17  ;;  %v1895_v37 = vsub.f32 1.0, %v2875_v19  ;;  %v1901_v28 = vmul.f32 %v2875_v19, %v1806_v22 }
0x1aac   :  { %v1893_v24 = vadd.f32 %v3486_v13, %v1892_v32  ;;  %v2102_v13 = vld [vmem:[%s3679_s1 + $0x1b0] sm:$0xff] }
0x1aad   :  { %v2743_v41 = vpack.c.bf16 %v2102_v13, %v2101_v14 }
0x1aae   :  { %2876 = vtanh.f32 %v1893_v24 }
0x1ab8   :  { %v2877_v29 = vpop.eup %2876 }
0x1ab9   :  { %1897 = vrot.lane.b32.xlu0 %v2877_v29, %s2923_s25 }
0x1b2b   :  { %v1898_v38 = vpop.permute.xlu0 %1897 }
0x1b2c   :  { %v1900_v39 = vmul.f32 %v1898_v38, %v1895_v37 }
0x1b2e   :  { %v1902_v40 = vadd.f32 %v1901_v28, %v1900_v39 }
0x1b30   :  { %1906 = vrot.lane.b32.xlu1 %v1902_v40, %s2923_s25 }
0x1ba2   :  { %v1907_v45 = vpop.permute.xlu1 %1906 }
0x1ba3   :  { %2440 = vmatmul.mubr.msk.f32.vlgmr.msra.gmra.mrb[26].mxu0 %vm223_vm0, %v1907_v45 }
0x1ba4   :  { %2744 = vmatpush3.bf16.msra.mxu0 %v2743_v41  ;;  %2462 = vmatprep.mubr.msk.f32.mxu0 %vm2926_vm2, %v2920_v7 }
0x1ba5   :  { %2745 = vmatprep.subr.bf16.mxu0 %v2925_v25 }
0x1ba8   :  { %2747 = vmatpush3.bf16.msra.mxu0 %v2746_v46 }
0x1ba9   :  { %2465 = vmatprep.subr.mxu0 %v2920_v7 }
0x1bab   :  { %2463 = vmatmul.mubr.msk.f32.vlgmr.msra.gmra.mrb[28].mxu0 %vm1060_vm1, %v2107_v48 }
0x1bac   :  { %2467 = vmatprep.mubr.msk.f32.mxu0 %vm2926_vm2, %v2920_v7 }
0x1c76   :  { %v1976_v50 = vpop.f32.mrb[26].mxu0 }
0x1c77   :  { %v1977_v51 = vadd.f32 %v1976_v50, %v3504_v20  ;;  %v1978_v49 = vpop.f32.mrb[27].mxu0 }
0x1c78   :  { %v1979_v0 = vadd.f32 %v1978_v49, %v3508_v34 }
0x1c79   :  { %v1981_v53 = vadd.f32 %v3480_v63, %v1977_v51 }
0x1c7b   :  { %v2441_v3 = vmul.f32 -1.442695, %v1981_v53 }
0x1c7d   :  { %2878 = vpow2.f32 %v2441_v3 }
0x1c7e   :  { %v2177_v23 = vpop.f32.mrb[28].mxu0 }
0x1c7f   :  { %2466 = vmatpush3.msk.msra.mxu0 %vm2185_vm3, %v2177_v23  ;;  %v2464_v61 = vpop.f32.mrb[29].mxu0  ;;  %v3625_v36 = vsel %vm2357_vm5, %v2177_v23, 0.0 }
0x1c80   :  { %2468 = vmatmul.mubr.msk.f32.vlgmr.msra.gmra.mrb[30].mxu0 %vm2181_vm4, %v2105_v57  ;;  %v2364_v44 = vrot.slane %v3625_v36, 2 }
0x1c87   :  { %v2879_v7 = vpop.eup %2878 }
0x1c88   :  { %v1985_v9 = vadd.f32 1.0, %v2879_v7 }
0x1c8a   :  { %2880 = vrcp.f32 %v1985_v9 }
0x1c94   :  { %v2881_v56 = vpop.eup %2880 }
0x1c95   :  { %v1988_v63 = vmul.f32 %v2881_v56, %v1979_v0  ;;  %v1991_v1 = vsub.f32 1.0, %v2881_v56  ;;  %v1997_v52 = vmul.f32 %v2881_v56, %v1902_v40 }
0x1c97   :  { %v1989_v15 = vadd.f32 %v3482_v10, %v1988_v63 }
0x1c99   :  { %2882 = vtanh.f32 %v1989_v15 }
0x1ca3   :  { %v2883_v4 = vpop.eup %2882 }
0x1ca4   :  { %1993 = vrot.lane.b32.xlu0 %v2883_v4, %s2923_s25 }
0x1d16   :  { %v1994_v2 = vpop.permute.xlu0 %1993 }
0x1d17   :  { %v1996_v33 = vmul.f32 %v1994_v2, %v1991_v1 }
0x1d19   :  { %v3618_v16 = vadd.f32 %v1997_v52, %v1996_v33 }
0x1d1b   :  { %2002 = vrot.lane.b32.xlu1 %v3618_v16, %s2923_s25 }
0x1d53   :  { %v2255_v11 = vpop.f32.mrb[30].mxu0 }
0x1d54   :  { %v2256_v10 = vadd.f32 %v2255_v11, %v2106_v5  ;;  %v2469_v18 = vpop.f32.mrb[31].mxu0 }
0x1d55   :  { %v2316_v18 = vld [vmem:[%s3679_s1 + $0x7] ss:$0 sm:$0xff] }
0x1d56   :  { %v2260_v21 = vmul.f32 0.01, %v2256_v10  ;;  %vm2259_vm6 = vcmp.ge.f32.partialorder %v2256_v10, 0.0 }
0x1d58   :  { %v2261_v35 = vsel %vm2259_vm6, %v2256_v10, %v2260_v21 }
0x1d59   :  { %v2263_v26 = vsel %vm2262_vm7, %v2261_v35, -inf  ;;  %v2359_v43 = vsel %vm2357_vm5, %v2261_v35, 0.0 }
0x1d5a   :  { %v2367_v54 = vrot.slane %v2359_v43, 6  ;;  %2264 = vmax.xlane.f32.xlu0 %v2263_v26 }
0x1d5c   :  { %v2373_v22 = vsel %vm2369_vm8, %v2364_v44, %v2367_v54 }
0x1d5d   :  { %v2374_v55 = vsel %vm2371_vm9, %v2373_v22, 0.0 }
0x1d5e   :  { %2376 = vst [vmem:[#allocation2 + $0x8] sm:$0xff] %v2374_v55 }
0x1d8d   :  { %v2003_v12 = vpop.permute.xlu1 %2002 }
0x1d8e   :  { %2442 = vmatmul.mubr.msk.f32.vlgmr.msra.gmra.mrb[18].mxu1 %vm223_vm0, %v2003_v12 }
0x1de7   :  { %v2265_v58 = vpop.xlane.xlu0 %2264 }
0x1de8   :  { %v2266_v59 = vsel %vm2185_vm3, %v2265_v58, -inf }
0x1de9   :  { %v2267_v27 = vrot.slane %v2266_v59, 4 }
0x1deb   :  { %v2268_v30 = vmax.f32 %v2266_v59, %v2267_v27 }
0x1ded   :  { %v2269_v31 = vrot.slane %v2268_v30, 2 }
0x1def   :  { %v2270_v6 = vmax.f32 %v2268_v30, %v2269_v31 }
0x1df1   :  { %v2271_v17 = vrot.slane %v2270_v6, 1 }
0x1df3   :  { %v2272_v19 = vmax.f32 %v2270_v6, %v2271_v17 }
0x1df5   :  { %v2273_v32 = vsub.f32 %v2265_v58, %v2272_v19 }
0x1df7   :  { %v2274_v24 = vmul.f32 1.442695, %v2273_v32 }
0x1df9   :  { %2884 = vpow2.f32 %v2274_v24 }
0x1e03   :  { %v2885_v25 = vpop.eup %2884 }
0x1e04   :  { %v2276_v29 = vsel %vm2185_vm3, %v2885_v25, 0.0 }
0x1e05   :  { %v2277_v39 = vrot.slane %v2276_v29, 4 }
0x1e07   :  { %v2278_v13 = vadd.f32 %v2277_v39, %v2276_v29 }
0x1e09   :  { %v2279_v41 = vrot.slane %v2278_v13, 2 }
0x1e0b   :  { %v2280_v8 = vadd.f32 %v2279_v41, %v2278_v13 }
0x1e0d   :  { %v2281_v45 = vrot.slane %v2280_v8, 1 }
0x1e0f   :  { %v2282_v47 = vadd.f32 %v2281_v45, %v2280_v8 }
0x1e61   :  { %v2072_v37 = vpop.f32.mrb[18].mxu1 }
0x1e62   :  { %v2073_v38 = vadd.f32 %v2072_v37, %v3504_v20  ;;  %v2074_v28 = vpop.f32.mrb[19].mxu1 }
0x1e63   :  { %v2075_v48 = vadd.f32 %v2074_v28, %v3508_v34 }
0x1e64   :  { %v2077_v40 = vadd.f32 %v3476_v60, %v2073_v38 }
0x1e66   :  { %v2443_v14 = vmul.f32 -1.442695, %v2077_v40 }
0x1e68   :  { %2886 = vpow2.f32 %v2443_v14 }
0x1e72   :  { %v2887_v42 = vpop.eup %2886 }
0x1e73   :  { %v2081_v46 = vadd.f32 1.0, %v2887_v42 }
0x1e75   :  { %2888 = vrcp.f32 %v2081_v46 }
0x1e76   :  { %2890 = vrcp.f32 %v2282_v47 }
0x1e7f   :  { %v2889_v50 = vpop.eup %2888 }
0x1e80   :  { %v2084_v51 = vmul.f32 %v2889_v50, %v2075_v48  ;;  %v2891_v49 = vpop.eup %2890  ;;  %v2087_v23 = vsub.f32 1.0, %v2889_v50  ;;  %v2093_v34 = vmul.f32 %v2889_v50, %v3618_v16  ;;  %v2315_v16 = vld [vmem:[%s3679_s1 + $0x6] ss:$0 sm:$0xff]  ;;  %s2927_s1 = smov [#allocation2]  }
0x1e81   :  { %v3639_v60 = vmul.f32 %v2891_v49, %v2885_v25  ;;  %s2382_s14 = sshll.u32 %s2927_s1, 4  ;;  %s2383_s14 = int_to_ptr.vmem [resolvable:$true] %s2382_s14 }
0x1e82   :  { %v2085_v20 = vadd.f32 %v3478_v62, %v2084_v51  ;;  %s2896_s15 = scalar_lea.vmem %s2383_s14, 256  ;;  %p2901_p1 = scmp.lt.s32.totalorder %s2383_s14, %s2383_s14 }
0x1e83   :  { %v2286_v53 = vrot.slane %v3639_v60, 4  ;;  %v2356_v14 = vsel %vm2355_vm12, %v3639_v60, 0.0  ;;  %p2897_p0 = scmp.ne.s32.totalorder %s2383_s14, %s2896_s15  ;;  %p2902_p2 = scmp.lt.s32.totalorder %s2896_s15, %s2896_s15 }
0x1e84   :  { %2892 = vtanh.f32 %v2085_v20  ;;  %v2361_v13 = vrot.slane %v2356_v14, 6 }
0x1e85   :  { %v2288_v57 = vsel %vm2185_vm3, %v3639_v60, %v2286_v53  ;;  %p2903_p3 = por %p2902_p2, %p2901_p1 }
0x1e87   :  { %p2904_p4 = pnand %p2903_p3, %p2897_p0 }
0x1e8e   :  { %v2893_v3 = vpop.eup %2892 }
0x1e8f   :  { %2089 = vrot.lane.b32.xlu1 %v2893_v3, %s2923_s25 }
0x1e93   :  { %2291 = vperm.xlu1 %2792, %v2288_v57  }
0x1f01   :  { %v2090_v61 = vpop.permute.xlu1 %2089 }
0x1f02   :  { %v2092_v7 = vmul.f32 %v2090_v61, %v2087_v23 }
0x1f04   :  { %v2094_v9 = vadd.f32 %v2093_v34, %v2092_v7 }
0x1f06   :  { %2096 = vrot.lane.b32.xlu1 %v2094_v9, %s2924_s0 }
0x1f12   :  { %v2292_v62 = vpop.permute.xlu1 %2291 }
0x1f78   :  { %v2097_v0 = vpop.permute.xlu1 %2096 }
0x1f79   :  { %v2099_v56 = vadd.f32 %v2097_v0, %v2094_v9 }
0x1f7b   :  { %v2294_v63 = vmul.f32 %v2292_v62, %v2099_v56 }
0x1f7d   :  { %v2295_v15 = vadd.f32 %v2294_v63, %v2099_v56 }
0x1f7f   :  { %2297 = vrot.lane.b32.xlu1 %v2295_v15, %s2923_s25 }
0x1ff1   :  { %v2298_v4 = vpop.permute.xlu1 %2297 }
0x1ff2   :  { %v2300_v1 = vsel %vm1060_vm1, %v2298_v4, 0.0 }
0x1ff3   :  { %2301 = vadd.xlane.f32.xlu1 %v2300_v1 }
0x2080   :  { %v2302_v2 = vpop.xlane.xlu1 %2301 }
0x2081   :  { %v2304_v52 = vmul.f32 0.03125, %v2302_v2 }
0x2083   :  { %v2305_v33 = vsub.f32 %v2295_v15, %v2304_v52 }
0x2085   :  { %v2306_v5 = vmul.f32 %v2305_v33, %v2305_v33 }
0x2087   :  { %2308 = vrot.lane.b32.xlu0 %v2306_v5, %s2923_s25 }
0x208b   :  { %2321 = vrot.lane.b32.xlu0 %v2315_v16, %s2923_s25 }
0x20f9   :  { %v2309_v11 = vpop.permute.xlu0 %2308 }
0x20fa   :  { %v2311_v10 = vsel %vm1060_vm1, %v2309_v11, 0.0 }
0x20fb   :  { %2312 = vadd.xlane.f32.xlu1 %v2311_v10 }
0x20fd   :  { %v2322_v54 = vpop.permute.xlu0 %2321 }
0x210c   :  { %2326 = vrot.lane.b32.xlu1 %v2316_v18, %s2923_s25 }
0x2188   :  { %v2313_v21 = vpop.xlane.xlu1 %2312 }
0x2189   :  { %v2314_v35 = vmul.f32 0.03125, %v2313_v21 }
0x218b   :  { %v2317_v26 = vadd.f32 1e-05, %v2314_v35 }
0x218c   :  { %v2327_v55 = vpop.permute.xlu1 %2326 }
0x218d   :  { %2894 = vrsqrt.f32 %v2317_v26 }
0x2197   :  { %v2895_v43 = vpop.eup %2894 }
0x2198   :  { %v2319_v22 = vmul.f32 %v2895_v43, %v2305_v33 }
0x219a   :  { %v2324_v12 = vmul.f32 %v2322_v54, %v2319_v22 }
0x219c   :  { %v2329_v58 = vadd.f32 %v2327_v55, %v2324_v12 }
0x219e   :  { %v2331_v59 = vsel %vm2330_vm10, %v2329_v58, 0.0  ;;  %v2339_v27 = vrot.slane %v2329_v58, 4 }
0x219f   :  { %v2332_v30 = vrot.slane %v2331_v59, 4 }
0x21a0   :  { %v2341_v31 = vsel %vm2330_vm10, %v2339_v27, 0.0 }
0x21a1   :  { %v2333_v6 = vadd.f32 %v2332_v30, %v2331_v59  ;;  %v2342_v17 = vrot.slane %v2341_v31, 4 }
0x21a3   :  { %v2334_v19 = vrot.slane %v2333_v6, 2  ;;  %v2343_v32 = vadd.f32 %v2342_v17, %v2341_v31 }
0x21a5   :  { %v2335_v24 = vadd.f32 %v2334_v19, %v2333_v6  ;;  %v2344_v25 = vrot.slane %v2343_v32, 2 }
0x21a7   :  { %v2336_v29 = vrot.slane %v2335_v24, 1  ;;  %v2345_v37 = vadd.f32 %v2344_v25, %v2343_v32 }
0x21a9   :  { %v2346_v38 = vrot.slane %v2345_v37, 1  ;;  %v2337_v28 = vadd.f32 %v2336_v29, %v2335_v24 }
0x21ab   :  { %v2347_v39 = vadd.f32 %v2346_v38, %v2345_v37 }
0x21ad   :  { %v2349_v40 = vsel %vm2348_vm11, %v2337_v28, %v2347_v39 }
0x21ae   :  { %2351 = vrot.lane.b32.xlu0 %v2349_v40, %s2923_s25 }
0x2220   :  { %v2352_v41 = vpop.permute.xlu0 %2351 }
0x2221   :  { %v2354_v8 = vsel %vm1060_vm1, %v2352_v41, 0.0 }
0x2222   :  { %v2370_v42 = vsel %vm2369_vm8, %v2354_v8, %v2361_v13 }
0x2223   :  { %v2372_v45 = vsel %vm2371_vm9, %v2370_v42, %v2364_v44 }
0x2224   :  { %2375 = vst [vmem:[#allocation2] sm:$0xff] %v2372_v45 }
0x2225   :  { %2907 = shalt.err (!%p2904_p4)
}
0x2226   :  { %s2908_s17 = scalar_lea.hbm %s3680_s2, 256 }
0x2227   :  { %p2909_p5 = scmp.ne.s32.totalorder %s3680_s2, %s2908_s17  ;;  %p2912_p6 = scmp.lt.u32.totalorder %s2908_s17, %s3680_s2 }
0x2229   :  { %p2914_p7 = pnand %p2912_p6, %p2909_p5 }
0x222b   :  { %2917 = shalt.err (!%p2914_p7)
}
0x222c   :  { %s2928_s22 = smov 128   ;;  %s2929_s23 = smov 8  }
0x222d   :  { %2388 = dma.vmem_to_hbm [thread:$0]  %s2383_s14, 256, %s3680_s2, [#allocation3], %s2928_s22, %s2928_s22, %s2929_s23  }
0x222e   :  { %2918 = dma.done.wait [#allocation3], 256  }
0x222f   :  { %2919 = vsyncadd [#allocation3], 4294967040 }
0x2230   :  { %2392 = vsyncpa [#allocation3], 1 }

</bundles_post_ra>
